<compile_context>
chip_gen: v7x
topology: tpu7x:2x2x1
jax: 0.10.0
libtpu: 0.0.40
codegen_flags: <defaults>
</compile_context>

<pallas_src>
import numpy as np
import jax
import jax.numpy as jnp
from jax.experimental import pallas as pl
from jax.experimental.pallas import tpu as pltpu


def make_lstm_kernel(T, Bp, H, L):
    """Fully-unrolled, wavefronted multi-layer LSTM forward + FC kernel.

    Refs:
      x_ref    : (T*Bp, P)     time-major flattened, zero-padded input
      wih0_ref : (P, 4H)       layer-0 input->gate weights (transposed, padded,
                               g-gate columns pre-scaled by 2)
      whh0_ref : (H, 4H)       layer-0 hidden->gate weights (transposed, g-scaled)
      wcat_ref : (Lr, 2H, 4H)  layers 1..L-1 packed [w_ih; w_hh] (transposed,
                               g-scaled)
      b_ref    : (L, 1, 4H)    combined bias b_ih + b_hh (g-gate cols pre-scaled)
      fcw_ref  : (H, Op)       final linear weight (transposed, lane-padded)
      fcb_ref  : (1, Op)       final linear bias (lane-padded)
      out_ref  : (Bp, Op)      output
    """

    def cell(gates, c):
        # Single full-lane-width sigmoid pass covers all four gates; the g-gate
        # pre-activation was pre-scaled by 2 so tanh(z) = 2*sigmoid(2z) - 1.
        sig = jax.nn.sigmoid(gates)
        i_g = sig[:, 0 * H:1 * H]
        f_g = sig[:, 1 * H:2 * H]
        g_g = 2.0 * sig[:, 2 * H:3 * H] - 1.0
        o_g = sig[:, 3 * H:4 * H]
        c_new = f_g * c + i_g * g_g
        h_new = o_g * jnp.tanh(c_new)
        return h_new, c_new

    def kernel(x_ref, wih0_ref, whh0_ref, wcat_ref, b_ref, fcw_ref, fcb_ref,
               out_ref):
        # Layer-0 input projection hoisted over the whole sequence: one MXU call.
        gx0 = jnp.dot(x_ref[...], wih0_ref[...],
                      preferred_element_type=jnp.float32) + b_ref[0]
        whh0 = whh0_ref[...]                         # (H, 4H), held in vregs
        wcat = [wcat_ref[l] for l in range(L - 1)]   # (2H, 4H) per upper layer
        bias = [b_ref[l] for l in range(L)]          # (1, 4H)

        h = [jnp.zeros((Bp, H), jnp.float32) for _ in range(L)]
        c = [jnp.zeros((Bp, H), jnp.float32) for _ in range(L)]

        # Wavefront over the (layer, time) nest: at step s, layer l runs time
        # t = s - l.  Work at the same s is mutually independent (layer l reads
        # layer l-1's output produced at step s-1), so the exposed dependent
        # chain is T + L - 1 steps instead of T * L.
        for s in range(T + L - 1):                   # static -> fully unrolled
            h_new = list(h)
            c_new = list(c)
            for l in range(L):                       # static -> fully unrolled
                t = s - l
                if not (0 <= t < T):
                    continue
                if l == 0:
                    gates = gx0[t * Bp:(t + 1) * Bp, :] + jnp.dot(
                        h[0], whh0, preferred_element_type=jnp.float32)
                else:
                    # Fused input + recurrent projection: one K=2H matmul on
                    # [h_below_t, h_{t-1}] against packed [w_ih; w_hh].
                    xin = jnp.concatenate([h[l - 1], h[l]], axis=-1)
                    gates = jnp.dot(xin, wcat[l - 1],
                                    preferred_element_type=jnp.float32) + bias[l]
                h_new[l], c_new[l] = cell(gates, c[l])
            h, c = h_new, c_new

        # fc(out[:, -1, :]) : last hidden state of the top layer, lane-dense out.
        out_ref[...] = (jnp.dot(h[L - 1], fcw_ref[...],
                                preferred_element_type=jnp.float32)
                        + fcb_ref[...])

    return kernel


def make_lstm_forward(layers, fc_w, fc_b):
    """Packs weights once (host side) and returns a jitted forward(x) -> (B, O).

    layers: list of (w_ih, w_hh, b_ih, b_hh) with PyTorch nn.LSTM shapes
      w_ih: (4H, in), w_hh: (4H, H), b_ih/b_hh: (4H,)
    fc_w: (O, H); fc_b: (O,)
    """
    L = len(layers)
    H = layers[0][1].shape[1]
    D = layers[0][0].shape[1]
    O = fc_w.shape[0]

    P = max(8, -(-D // 8) * 8)           # pad features to sublane multiple
    Op = max(128, -(-O // 128) * 128)    # lane-dense FC output
    Lr = max(L - 1, 1)
    g = slice(2 * H, 3 * H)              # g-gate columns

    # ---- one-time host-side packing (transposed so kernel does x @ W) ----
    wih0 = np.zeros((P, 4 * H), np.float32)
    wih0[:D, :] = np.asarray(layers[0][0]).T
    whh0 = np.asarray(layers[0][1], dtype=np.float32).T.copy()       # (H, 4H)
    wcat = np.zeros((Lr, 2 * H, 4 * H), np.float32)
    b = np.zeros((L, 1, 4 * H), np.float32)
    for l, (w_ih, w_hh, b_ih, b_hh) in enumerate(layers):
        b[l, 0, :] = np.asarray(b_ih) + np.asarray(b_hh)
        if l > 0:
            wcat[l - 1, :H, :] = np.asarray(w_ih).T
            wcat[l - 1, H:, :] = np.asarray(w_hh).T
    # Pre-scale the g-gate pre-activation by 2 (weights + bias) so the kernel
    # can use tanh(z) = 2*sigmoid(2z) - 1 with a single sigmoid pass.
    wih0[:, g] *= 2.0
    whh0[:, g] *= 2.0
    wcat[:, :, g] *= 2.0
    b[:, :, g] *= 2.0
    fcw = np.zeros((H, Op), np.float32)
    fcw[:, :O] = np.asarray(fc_w).T
    fcb = np.zeros((1, Op), np.float32)
    fcb[0, :O] = np.asarray(fc_b)

    # Device-resident packed params (captured as constants by the jitted fn).
    wih0_d = jnp.asarray(wih0)
    whh0_d = jnp.asarray(whh0)
    wcat_d = jnp.asarray(wcat)
    b_d = jnp.asarray(b)
    fcw_d = jnp.asarray(fcw)
    fcb_d = jnp.asarray(fcb)

    vmem = pl.BlockSpec(memory_space=pltpu.MemorySpace.VMEM)

    # NOTE: at production scale (large T/B/H) this whole-sequence-in-VMEM design
    # should be re-tiled: chunk the hoisted gx0 projection over T with
    # double-buffered VMEM scratch (size against v7x's 64 MiB, not v6e's 128),
    # stage weights/activations in bf16 with f32 accumulation, set
    # pltpu.CompilerParams(vmem_limit_bytes=...) explicitly, and add a parallel
    # batch grid axis so v7x's second TensorCore is used.  At these toy sizes
    # (<100 KB live) none of that is needed.
    def forward(x):
        x = jnp.asarray(x, jnp.float32)
        B, T, _ = x.shape
        Bp = max(8, -(-B // 8) * 8)      # pad batch to 8-sublane multiple

        # (B, T, D) -> (T, Bp, P) zero-padded -> flat time-major (T*Bp, P)
        x_tbd = jnp.transpose(x, (1, 0, 2))
        x_pad = jnp.zeros((T, Bp, P), jnp.float32).at[:, :B, :D].set(x_tbd)
        x_flat = x_pad.reshape(T * Bp, P)

        out = pl.pallas_call(
            make_lstm_kernel(T, Bp, H, L),
            out_shape=jax.ShapeDtypeStruct((Bp, Op), jnp.float32),
            in_specs=[vmem] * 7,
            out_specs=vmem,
        )(x_flat, wih0_d, whh0_d, wcat_d, b_d, fcw_d, fcb_d)
        return out[:B, :O]

    return jax.jit(forward)


def lstm_model_ref(x, layers, fc_w, fc_b):
    """Pure-JAX reference mirroring PyTorch nn.LSTM (eval) + Linear."""
    B, T, _ = x.shape
    inp = x.astype(jnp.float32)
    for (w_ih, w_hh, b_ih, b_hh) in layers:
        H = w_hh.shape[1]
        h = jnp.zeros((B, H), jnp.float32)
        c = jnp.zeros((B, H), jnp.float32)
        outs = []
        for t in range(T):
            gates = inp[:, t, :] @ w_ih.T + b_ih + h @ w_hh.T + b_hh
            i = jax.nn.sigmoid(gates[:, 0 * H:1 * H])
            f = jax.nn.sigmoid(gates[:, 1 * H:2 * H])
            g = jnp.tanh(gates[:, 2 * H:3 * H])
            o = jax.nn.sigmoid(gates[:, 3 * H:4 * H])
            c = f * c + i * g
            h = o * jnp.tanh(c)
            outs.append(h)
        inp = jnp.stack(outs, axis=1)
    return inp[:, -1, :] @ fc_w.T + fc_b


if __name__ == "__main__":
    # small shapes consistent with the module
    B, T, D = 4, 8, 8          # batch, seq, input_size
    H, L, O = 32, 2, 4         # hidden_size, num_layers, output_size

    key = jax.random.PRNGKey(0)
    k = 1.0 / np.sqrt(H)

    layers = []
    for l in range(L):
        in_l = D if l == 0 else H
        key, k1, k2, k3, k4 = jax.random.split(key, 5)
        w_ih = jax.random.uniform(k1, (4 * H, in_l), jnp.float32, -k, k)
        w_hh = jax.random.uniform(k2, (4 * H, H), jnp.float32, -k, k)
        b_ih = jax.random.uniform(k3, (4 * H,), jnp.float32, -k, k)
        b_hh = jax.random.uniform(k4, (4 * H,), jnp.float32, -k, k)
        layers.append((w_ih, w_hh, b_ih, b_hh))

    key, kf1, kf2, kx = jax.random.split(key, 4)
    fc_w = jax.random.uniform(kf1, (O, H), jnp.float32, -k, k)
    fc_b = jax.random.uniform(kf2, (O,), jnp.float32, -k, k)

    x = jax.random.normal(kx, (B, T, D), jnp.float32)

    forward = make_lstm_forward(layers, fc_w, fc_b)   # packs weights once
    out = jax.block_until_ready(forward(x))

    ref = jax.block_until_ready(lstm_model_ref(x, layers, fc_w, fc_b))
    assert out.shape == (B, O)
    np.testing.assert_allclose(np.asarray(out), np.asarray(ref),
                               rtol=1e-4, atol=1e-4)
    print("KERNEL_OK")
</pallas_src>

<mosaic_0001>
module attributes {stable_mosaic.version = 11 : i64} {
  func.func @kernel(%arg0: memref<64x8xf32, #tpu.memory_space<vmem>>, %arg1: memref<8x128xf32, #tpu.memory_space<vmem>>, %arg2: memref<32x128xf32, #tpu.memory_space<vmem>>, %arg3: memref<1x64x128xf32, #tpu.memory_space<vmem>>, %arg4: memref<2x1x128xf32, #tpu.memory_space<vmem>>, %arg5: memref<32x128xf32, #tpu.memory_space<vmem>>, %arg6: memref<1x128xf32, #tpu.memory_space<vmem>>, %arg7: memref<8x128xf32, #tpu.memory_space<vmem>>) attributes {dimension_semantics = [], scalar_prefetch = 0 : i64, scratch_operands = 0 : i64, tpu.core_type = #tpu.core_type<tc>} {
    %c0 = arith.constant 0 : index
    %c0_0 = arith.constant 0 : index
    %0 = vector.load %arg0[%c0, %c0_0] : memref<64x8xf32, #tpu.memory_space<vmem>>, vector<64x8xf32>
    %c0_1 = arith.constant 0 : index
    %c0_2 = arith.constant 0 : index
    %1 = vector.load %arg1[%c0_1, %c0_2] : memref<8x128xf32, #tpu.memory_space<vmem>>, vector<8x128xf32>
    %cst = arith.constant dense<0.000000e+00> : vector<64x128xf32>
    %2 = tpu.matmul %0, %1, %cst {dimension_numbers = #tpu.dot_dimension_numbers<[1], [0], [0], [1], [0, 0, 1, 1], [], []>} : vector<64x8xf32>, vector<8x128xf32>, vector<64x128xf32> -> vector<64x128xf32>
    %c0_3 = arith.constant 0 : index
    %c0_4 = arith.constant 0 : index
    %c0_5 = arith.constant 0 : index
    %3 = vector.load %arg4[%c0_3, %c0_4, %c0_5] : memref<2x1x128xf32, #tpu.memory_space<vmem>>, vector<1x1x128xf32>
    %4 = vector.shape_cast %3 : vector<1x1x128xf32> to vector<1x128xf32>
    %5 = vector.broadcast %4 : vector<1x128xf32> to vector<64x128xf32>
    %6 = arith.addf %2, %5 : vector<64x128xf32>
    %c0_6 = arith.constant 0 : index
    %c0_7 = arith.constant 0 : index
    %7 = vector.load %arg2[%c0_6, %c0_7] : memref<32x128xf32, #tpu.memory_space<vmem>>, vector<32x128xf32>
    %c0_8 = arith.constant 0 : index
    %c0_9 = arith.constant 0 : index
    %c0_10 = arith.constant 0 : index
    %8 = vector.load %arg3[%c0_8, %c0_9, %c0_10] : memref<1x64x128xf32, #tpu.memory_space<vmem>>, vector<1x64x128xf32>
    %9 = vector.shape_cast %8 : vector<1x64x128xf32> to vector<64x128xf32>
    %c1 = arith.constant 1 : index
    %c0_11 = arith.constant 0 : index
    %c0_12 = arith.constant 0 : index
    %10 = vector.load %arg4[%c1, %c0_11, %c0_12] : memref<2x1x128xf32, #tpu.memory_space<vmem>>, vector<1x1x128xf32>
    %11 = vector.shape_cast %10 : vector<1x1x128xf32> to vector<1x128xf32>
    %cst_13 = arith.constant 0.000000e+00 : f32
    %12 = vector.broadcast %cst_13 : f32 to vector<8x32xf32>
    %cst_14 = arith.constant 0.000000e+00 : f32
    %13 = vector.broadcast %cst_14 : f32 to vector<8x32xf32>
    %cst_15 = arith.constant 0.000000e+00 : f32
    %14 = vector.broadcast %cst_15 : f32 to vector<8x32xf32>
    %cst_16 = arith.constant 0.000000e+00 : f32
    %15 = vector.broadcast %cst_16 : f32 to vector<8x32xf32>
    %16 = vector.extract_strided_slice %6 {offsets = [0, 0], sizes = [8, 128], strides = [1, 1]} : vector<64x128xf32> to vector<8x128xf32>
    %cst_17 = arith.constant dense<0.000000e+00> : vector<8x128xf32>
    %17 = tpu.matmul %12, %7, %cst_17 {dimension_numbers = #tpu.dot_dimension_numbers<[1], [0], [0], [1], [0, 0, 1, 1], [], []>} : vector<8x32xf32>, vector<32x128xf32>, vector<8x128xf32> -> vector<8x128xf32>
    %18 = arith.addf %16, %17 : vector<8x128xf32>
    %19 = arith.negf %18 : vector<8x128xf32>
    %20 = math.exp %19 : vector<8x128xf32>
    %cst_18 = arith.constant 1.000000e+00 : f32
    %21 = vector.broadcast %cst_18 : f32 to vector<8x128xf32>
    %22 = arith.addf %21, %20 : vector<8x128xf32>
    %23 = arith.divf %21, %22 : vector<8x128xf32>
    %24 = vector.extract_strided_slice %23 {offsets = [0, 0], sizes = [8, 32], strides = [1, 1]} : vector<8x128xf32> to vector<8x32xf32>
    %25 = vector.extract_strided_slice %23 {offsets = [0, 32], sizes = [8, 32], strides = [1, 1]} : vector<8x128xf32> to vector<8x32xf32>
    %26 = vector.extract_strided_slice %23 {offsets = [0, 64], sizes = [8, 32], strides = [1, 1]} : vector<8x128xf32> to vector<8x32xf32>
    %cst_19 = arith.constant 2.000000e+00 : f32
    %27 = vector.broadcast %cst_19 : f32 to vector<8x32xf32>
    %28 = arith.mulf %27, %26 : vector<8x32xf32>
    %cst_20 = arith.constant 1.000000e+00 : f32
    %29 = vector.broadcast %cst_20 : f32 to vector<8x32xf32>
    %30 = arith.subf %28, %29 : vector<8x32xf32>
    %31 = vector.extract_strided_slice %23 {offsets = [0, 96], sizes = [8, 32], strides = [1, 1]} : vector<8x128xf32> to vector<8x32xf32>
    %32 = arith.mulf %25, %14 : vector<8x32xf32>
    %33 = arith.mulf %24, %30 : vector<8x32xf32>
    %34 = arith.addf %32, %33 : vector<8x32xf32>
    %35 = math.tanh %34 : vector<8x32xf32>
    %36 = arith.mulf %31, %35 : vector<8x32xf32>
    %37 = vector.extract_strided_slice %6 {offsets = [8, 0], sizes = [8, 128], strides = [1, 1]} : vector<64x128xf32> to vector<8x128xf32>
    %cst_21 = arith.constant dense<0.000000e+00> : vector<8x128xf32>
    %38 = tpu.matmul %36, %7, %cst_21 {dimension_numbers = #tpu.dot_dimension_numbers<[1], [0], [0], [1], [0, 0, 1, 1], [], []>} : vector<8x32xf32>, vector<32x128xf32>, vector<8x128xf32> -> vector<8x128xf32>
    %39 = arith.addf %37, %38 : vector<8x128xf32>
    %40 = arith.negf %39 : vector<8x128xf32>
    %41 = math.exp %40 : vector<8x128xf32>
    %cst_22 = arith.constant 1.000000e+00 : f32
    %42 = vector.broadcast %cst_22 : f32 to vector<8x128xf32>
    %43 = arith.addf %42, %41 : vector<8x128xf32>
    %44 = arith.divf %42, %43 : vector<8x128xf32>
    %45 = vector.extract_strided_slice %44 {offsets = [0, 0], sizes = [8, 32], strides = [1, 1]} : vector<8x128xf32> to vector<8x32xf32>
    %46 = vector.extract_strided_slice %44 {offsets = [0, 32], sizes = [8, 32], strides = [1, 1]} : vector<8x128xf32> to vector<8x32xf32>
    %47 = vector.extract_strided_slice %44 {offsets = [0, 64], sizes = [8, 32], strides = [1, 1]} : vector<8x128xf32> to vector<8x32xf32>
    %cst_23 = arith.constant 2.000000e+00 : f32
    %48 = vector.broadcast %cst_23 : f32 to vector<8x32xf32>
    %49 = arith.mulf %48, %47 : vector<8x32xf32>
    %cst_24 = arith.constant 1.000000e+00 : f32
    %50 = vector.broadcast %cst_24 : f32 to vector<8x32xf32>
    %51 = arith.subf %49, %50 : vector<8x32xf32>
    %52 = vector.extract_strided_slice %44 {offsets = [0, 96], sizes = [8, 32], strides = [1, 1]} : vector<8x128xf32> to vector<8x32xf32>
    %53 = arith.mulf %46, %34 : vector<8x32xf32>
    %54 = arith.mulf %45, %51 : vector<8x32xf32>
    %55 = arith.addf %53, %54 : vector<8x32xf32>
    %56 = math.tanh %55 : vector<8x32xf32>
    %57 = arith.mulf %52, %56 : vector<8x32xf32>
    %58 = tpu.concatenate %36, %13 in 1 : vector<8x32xf32>, vector<8x32xf32> -> vector<8x64xf32>
    %cst_25 = arith.constant dense<0.000000e+00> : vector<8x128xf32>
    %59 = tpu.matmul %58, %9, %cst_25 {dimension_numbers = #tpu.dot_dimension_numbers<[1], [0], [0], [1], [0, 0, 1, 1], [], []>} : vector<8x64xf32>, vector<64x128xf32>, vector<8x128xf32> -> vector<8x128xf32>
    %60 = vector.broadcast %11 : vector<1x128xf32> to vector<8x128xf32>
    %61 = arith.addf %59, %60 : vector<8x128xf32>
    %62 = arith.negf %61 : vector<8x128xf32>
    %63 = math.exp %62 : vector<8x128xf32>
    %cst_26 = arith.constant 1.000000e+00 : f32
    %64 = vector.broadcast %cst_26 : f32 to vector<8x128xf32>
    %65 = arith.addf %64, %63 : vector<8x128xf32>
    %66 = arith.divf %64, %65 : vector<8x128xf32>
    %67 = vector.extract_strided_slice %66 {offsets = [0, 0], sizes = [8, 32], strides = [1, 1]} : vector<8x128xf32> to vector<8x32xf32>
    %68 = vector.extract_strided_slice %66 {offsets = [0, 32], sizes = [8, 32], strides = [1, 1]} : vector<8x128xf32> to vector<8x32xf32>
    %69 = vector.extract_strided_slice %66 {offsets = [0, 64], sizes = [8, 32], strides = [1, 1]} : vector<8x128xf32> to vector<8x32xf32>
    %cst_27 = arith.constant 2.000000e+00 : f32
    %70 = vector.broadcast %cst_27 : f32 to vector<8x32xf32>
    %71 = arith.mulf %70, %69 : vector<8x32xf32>
    %cst_28 = arith.constant 1.000000e+00 : f32
    %72 = vector.broadcast %cst_28 : f32 to vector<8x32xf32>
    %73 = arith.subf %71, %72 : vector<8x32xf32>
    %74 = vector.extract_strided_slice %66 {offsets = [0, 96], sizes = [8, 32], strides = [1, 1]} : vector<8x128xf32> to vector<8x32xf32>
    %75 = arith.mulf %68, %15 : vector<8x32xf32>
    %76 = arith.mulf %67, %73 : vector<8x32xf32>
    %77 = arith.addf %75, %76 : vector<8x32xf32>
    %78 = math.tanh %77 : vector<8x32xf32>
    %79 = arith.mulf %74, %78 : vector<8x32xf32>
    %80 = vector.extract_strided_slice %6 {offsets = [16, 0], sizes = [8, 128], strides = [1, 1]} : vector<64x128xf32> to vector<8x128xf32>
    %cst_29 = arith.constant dense<0.000000e+00> : vector<8x128xf32>
    %81 = tpu.matmul %57, %7, %cst_29 {dimension_numbers = #tpu.dot_dimension_numbers<[1], [0], [0], [1], [0, 0, 1, 1], [], []>} : vector<8x32xf32>, vector<32x128xf32>, vector<8x128xf32> -> vector<8x128xf32>
    %82 = arith.addf %80, %81 : vector<8x128xf32>
    %83 = arith.negf %82 : vector<8x128xf32>
    %84 = math.exp %83 : vector<8x128xf32>
    %cst_30 = arith.constant 1.000000e+00 : f32
    %85 = vector.broadcast %cst_30 : f32 to vector<8x128xf32>
    %86 = arith.addf %85, %84 : vector<8x128xf32>
    %87 = arith.divf %85, %86 : vector<8x128xf32>
    %88 = vector.extract_strided_slice %87 {offsets = [0, 0], sizes = [8, 32], strides = [1, 1]} : vector<8x128xf32> to vector<8x32xf32>
    %89 = vector.extract_strided_slice %87 {offsets = [0, 32], sizes = [8, 32], strides = [1, 1]} : vector<8x128xf32> to vector<8x32xf32>
    %90 = vector.extract_strided_slice %87 {offsets = [0, 64], sizes = [8, 32], strides = [1, 1]} : vector<8x128xf32> to vector<8x32xf32>
    %cst_31 = arith.constant 2.000000e+00 : f32
    %91 = vector.broadcast %cst_31 : f32 to vector<8x32xf32>
    %92 = arith.mulf %91, %90 : vector<8x32xf32>
    %cst_32 = arith.constant 1.000000e+00 : f32
    %93 = vector.broadcast %cst_32 : f32 to vector<8x32xf32>
    %94 = arith.subf %92, %93 : vector<8x32xf32>
    %95 = vector.extract_strided_slice %87 {offsets = [0, 96], sizes = [8, 32], strides = [1, 1]} : vector<8x128xf32> to vector<8x32xf32>
    %96 = arith.mulf %89, %55 : vector<8x32xf32>
    %97 = arith.mulf %88, %94 : vector<8x32xf32>
    %98 = arith.addf %96, %97 : vector<8x32xf32>
    %99 = math.tanh %98 : vector<8x32xf32>
    %100 = arith.mulf %95, %99 : vector<8x32xf32>
    %101 = tpu.concatenate %57, %79 in 1 : vector<8x32xf32>, vector<8x32xf32> -> vector<8x64xf32>
    %cst_33 = arith.constant dense<0.000000e+00> : vector<8x128xf32>
    %102 = tpu.matmul %101, %9, %cst_33 {dimension_numbers = #tpu.dot_dimension_numbers<[1], [0], [0], [1], [0, 0, 1, 1], [], []>} : vector<8x64xf32>, vector<64x128xf32>, vector<8x128xf32> -> vector<8x128xf32>
    %103 = vector.broadcast %11 : vector<1x128xf32> to vector<8x128xf32>
    %104 = arith.addf %102, %103 : vector<8x128xf32>
    %105 = arith.negf %104 : vector<8x128xf32>
    %106 = math.exp %105 : vector<8x128xf32>
    %cst_34 = arith.constant 1.000000e+00 : f32
    %107 = vector.broadcast %cst_34 : f32 to vector<8x128xf32>
    %108 = arith.addf %107, %106 : vector<8x128xf32>
    %109 = arith.divf %107, %108 : vector<8x128xf32>
    %110 = vector.extract_strided_slice %109 {offsets = [0, 0], sizes = [8, 32], strides = [1, 1]} : vector<8x128xf32> to vector<8x32xf32>
    %111 = vector.extract_strided_slice %109 {offsets = [0, 32], sizes = [8, 32], strides = [1, 1]} : vector<8x128xf32> to vector<8x32xf32>
    %112 = vector.extract_strided_slice %109 {offsets = [0, 64], sizes = [8, 32], strides = [1, 1]} : vector<8x128xf32> to vector<8x32xf32>
    %cst_35 = arith.constant 2.000000e+00 : f32
    %113 = vector.broadcast %cst_35 : f32 to vector<8x32xf32>
    %114 = arith.mulf %113, %112 : vector<8x32xf32>
    %cst_36 = arith.constant 1.000000e+00 : f32
    %115 = vector.broadcast %cst_36 : f32 to vector<8x32xf32>
    %116 = arith.subf %114, %115 : vector<8x32xf32>
    %117 = vector.extract_strided_slice %109 {offsets = [0, 96], sizes = [8, 32], strides = [1, 1]} : vector<8x128xf32> to vector<8x32xf32>
    %118 = arith.mulf %111, %77 : vector<8x32xf32>
    %119 = arith.mulf %110, %116 : vector<8x32xf32>
    %120 = arith.addf %118, %119 : vector<8x32xf32>
    %121 = math.tanh %120 : vector<8x32xf32>
    %122 = arith.mulf %117, %121 : vector<8x32xf32>
    %123 = vector.extract_strided_slice %6 {offsets = [24, 0], sizes = [8, 128], strides = [1, 1]} : vector<64x128xf32> to vector<8x128xf32>
    %cst_37 = arith.constant dense<0.000000e+00> : vector<8x128xf32>
    %124 = tpu.matmul %100, %7, %cst_37 {dimension_numbers = #tpu.dot_dimension_numbers<[1], [0], [0], [1], [0, 0, 1, 1], [], []>} : vector<8x32xf32>, vector<32x128xf32>, vector<8x128xf32> -> vector<8x128xf32>
    %125 = arith.addf %123, %124 : vector<8x128xf32>
    %126 = arith.negf %125 : vector<8x128xf32>
    %127 = math.exp %126 : vector<8x128xf32>
    %cst_38 = arith.constant 1.000000e+00 : f32
    %128 = vector.broadcast %cst_38 : f32 to vector<8x128xf32>
    %129 = arith.addf %128, %127 : vector<8x128xf32>
    %130 = arith.divf %128, %129 : vector<8x128xf32>
    %131 = vector.extract_strided_slice %130 {offsets = [0, 0], sizes = [8, 32], strides = [1, 1]} : vector<8x128xf32> to vector<8x32xf32>
    %132 = vector.extract_strided_slice %130 {offsets = [0, 32], sizes = [8, 32], strides = [1, 1]} : vector<8x128xf32> to vector<8x32xf32>
    %133 = vector.extract_strided_slice %130 {offsets = [0, 64], sizes = [8, 32], strides = [1, 1]} : vector<8x128xf32> to vector<8x32xf32>
    %cst_39 = arith.constant 2.000000e+00 : f32
    %134 = vector.broadcast %cst_39 : f32 to vector<8x32xf32>
    %135 = arith.mulf %134, %133 : vector<8x32xf32>
    %cst_40 = arith.constant 1.000000e+00 : f32
    %136 = vector.broadcast %cst_40 : f32 to vector<8x32xf32>
    %137 = arith.subf %135, %136 : vector<8x32xf32>
    %138 = vector.extract_strided_slice %130 {offsets = [0, 96], sizes = [8, 32], strides = [1, 1]} : vector<8x128xf32> to vector<8x32xf32>
    %139 = arith.mulf %132, %98 : vector<8x32xf32>
    %140 = arith.mulf %131, %137 : vector<8x32xf32>
    %141 = arith.addf %139, %140 : vector<8x32xf32>
    %142 = math.tanh %141 : vector<8x32xf32>
    %143 = arith.mulf %138, %142 : vector<8x32xf32>
    %144 = tpu.concatenate %100, %122 in 1 : vector<8x32xf32>, vector<8x32xf32> -> vector<8x64xf32>
    %cst_41 = arith.constant dense<0.000000e+00> : vector<8x128xf32>
    %145 = tpu.matmul %144, %9, %cst_41 {dimension_numbers = #tpu.dot_dimension_numbers<[1], [0], [0], [1], [0, 0, 1, 1], [], []>} : vector<8x64xf32>, vector<64x128xf32>, vector<8x128xf32> -> vector<8x128xf32>
    %146 = vector.broadcast %11 : vector<1x128xf32> to vector<8x128xf32>
    %147 = arith.addf %145, %146 : vector<8x128xf32>
    %148 = arith.negf %147 : vector<8x128xf32>
    %149 = math.exp %148 : vector<8x128xf32>
    %cst_42 = arith.constant 1.000000e+00 : f32
    %150 = vector.broadcast %cst_42 : f32 to vector<8x128xf32>
    %151 = arith.addf %150, %149 : vector<8x128xf32>
    %152 = arith.divf %150, %151 : vector<8x128xf32>
    %153 = vector.extract_strided_slice %152 {offsets = [0, 0], sizes = [8, 32], strides = [1, 1]} : vector<8x128xf32> to vector<8x32xf32>
    %154 = vector.extract_strided_slice %152 {offsets = [0, 32], sizes = [8, 32], strides = [1, 1]} : vector<8x128xf32> to vector<8x32xf32>
    %155 = vector.extract_strided_slice %152 {offsets = [0, 64], sizes = [8, 32], strides = [1, 1]} : vector<8x128xf32> to vector<8x32xf32>
    %cst_43 = arith.constant 2.000000e+00 : f32
    %156 = vector.broadcast %cst_43 : f32 to vector<8x32xf32>
    %157 = arith.mulf %156, %155 : vector<8x32xf32>
    %cst_44 = arith.constant 1.000000e+00 : f32
    %158 = vector.broadcast %cst_44 : f32 to vector<8x32xf32>
    %159 = arith.subf %157, %158 : vector<8x32xf32>
    %160 = vector.extract_strided_slice %152 {offsets = [0, 96], sizes = [8, 32], strides = [1, 1]} : vector<8x128xf32> to vector<8x32xf32>
    %161 = arith.mulf %154, %120 : vector<8x32xf32>
    %162 = arith.mulf %153, %159 : vector<8x32xf32>
    %163 = arith.addf %161, %162 : vector<8x32xf32>
    %164 = math.tanh %163 : vector<8x32xf32>
    %165 = arith.mulf %160, %164 : vector<8x32xf32>
    %166 = vector.extract_strided_slice %6 {offsets = [32, 0], sizes = [8, 128], strides = [1, 1]} : vector<64x128xf32> to vector<8x128xf32>
    %cst_45 = arith.constant dense<0.000000e+00> : vector<8x128xf32>
    %167 = tpu.matmul %143, %7, %cst_45 {dimension_numbers = #tpu.dot_dimension_numbers<[1], [0], [0], [1], [0, 0, 1, 1], [], []>} : vector<8x32xf32>, vector<32x128xf32>, vector<8x128xf32> -> vector<8x128xf32>
    %168 = arith.addf %166, %167 : vector<8x128xf32>
    %169 = arith.negf %168 : vector<8x128xf32>
    %170 = math.exp %169 : vector<8x128xf32>
    %cst_46 = arith.constant 1.000000e+00 : f32
    %171 = vector.broadcast %cst_46 : f32 to vector<8x128xf32>
    %172 = arith.addf %171, %170 : vector<8x128xf32>
    %173 = arith.divf %171, %172 : vector<8x128xf32>
    %174 = vector.extract_strided_slice %173 {offsets = [0, 0], sizes = [8, 32], strides = [1, 1]} : vector<8x128xf32> to vector<8x32xf32>
    %175 = vector.extract_strided_slice %173 {offsets = [0, 32], sizes = [8, 32], strides = [1, 1]} : vector<8x128xf32> to vector<8x32xf32>
    %176 = vector.extract_strided_slice %173 {offsets = [0, 64], sizes = [8, 32], strides = [1, 1]} : vector<8x128xf32> to vector<8x32xf32>
    %cst_47 = arith.constant 2.000000e+00 : f32
    %177 = vector.broadcast %cst_47 : f32 to vector<8x32xf32>
    %178 = arith.mulf %177, %176 : vector<8x32xf32>
    %cst_48 = arith.constant 1.000000e+00 : f32
    %179 = vector.broadcast %cst_48 : f32 to vector<8x32xf32>
    %180 = arith.subf %178, %179 : vector<8x32xf32>
    %181 = vector.extract_strided_slice %173 {offsets = [0, 96], sizes = [8, 32], strides = [1, 1]} : vector<8x128xf32> to vector<8x32xf32>
    %182 = arith.mulf %175, %141 : vector<8x32xf32>
    %183 = arith.mulf %174, %180 : vector<8x32xf32>
    %184 = arith.addf %182, %183 : vector<8x32xf32>
    %185 = math.tanh %184 : vector<8x32xf32>
    %186 = arith.mulf %181, %185 : vector<8x32xf32>
    %187 = tpu.concatenate %143, %165 in 1 : vector<8x32xf32>, vector<8x32xf32> -> vector<8x64xf32>
    %cst_49 = arith.constant dense<0.000000e+00> : vector<8x128xf32>
    %188 = tpu.matmul %187, %9, %cst_49 {dimension_numbers = #tpu.dot_dimension_numbers<[1], [0], [0], [1], [0, 0, 1, 1], [], []>} : vector<8x64xf32>, vector<64x128xf32>, vector<8x128xf32> -> vector<8x128xf32>
    %189 = vector.broadcast %11 : vector<1x128xf32> to vector<8x128xf32>
    %190 = arith.addf %188, %189 : vector<8x128xf32>
    %191 = arith.negf %190 : vector<8x128xf32>
    %192 = math.exp %191 : vector<8x128xf32>
    %cst_50 = arith.constant 1.000000e+00 : f32
    %193 = vector.broadcast %cst_50 : f32 to vector<8x128xf32>
    %194 = arith.addf %193, %192 : vector<8x128xf32>
    %195 = arith.divf %193, %194 : vector<8x128xf32>
    %196 = vector.extract_strided_slice %195 {offsets = [0, 0], sizes = [8, 32], strides = [1, 1]} : vector<8x128xf32> to vector<8x32xf32>
    %197 = vector.extract_strided_slice %195 {offsets = [0, 32], sizes = [8, 32], strides = [1, 1]} : vector<8x128xf32> to vector<8x32xf32>
    %198 = vector.extract_strided_slice %195 {offsets = [0, 64], sizes = [8, 32], strides = [1, 1]} : vector<8x128xf32> to vector<8x32xf32>
    %cst_51 = arith.constant 2.000000e+00 : f32
    %199 = vector.broadcast %cst_51 : f32 to vector<8x32xf32>
    %200 = arith.mulf %199, %198 : vector<8x32xf32>
    %cst_52 = arith.constant 1.000000e+00 : f32
    %201 = vector.broadcast %cst_52 : f32 to vector<8x32xf32>
    %202 = arith.subf %200, %201 : vector<8x32xf32>
    %203 = vector.extract_strided_slice %195 {offsets = [0, 96], sizes = [8, 32], strides = [1, 1]} : vector<8x128xf32> to vector<8x32xf32>
    %204 = arith.mulf %197, %163 : vector<8x32xf32>
    %205 = arith.mulf %196, %202 : vector<8x32xf32>
    %206 = arith.addf %204, %205 : vector<8x32xf32>
    %207 = math.tanh %206 : vector<8x32xf32>
    %208 = arith.mulf %203, %207 : vector<8x32xf32>
    %209 = vector.extract_strided_slice %6 {offsets = [40, 0], sizes = [8, 128], strides = [1, 1]} : vector<64x128xf32> to vector<8x128xf32>
    %cst_53 = arith.constant dense<0.000000e+00> : vector<8x128xf32>
    %210 = tpu.matmul %186, %7, %cst_53 {dimension_numbers = #tpu.dot_dimension_numbers<[1], [0], [0], [1], [0, 0, 1, 1], [], []>} : vector<8x32xf32>, vector<32x128xf32>, vector<8x128xf32> -> vector<8x128xf32>
    %211 = arith.addf %209, %210 : vector<8x128xf32>
    %212 = arith.negf %211 : vector<8x128xf32>
    %213 = math.exp %212 : vector<8x128xf32>
    %cst_54 = arith.constant 1.000000e+00 : f32
    %214 = vector.broadcast %cst_54 : f32 to vector<8x128xf32>
    %215 = arith.addf %214, %213 : vector<8x128xf32>
    %216 = arith.divf %214, %215 : vector<8x128xf32>
    %217 = vector.extract_strided_slice %216 {offsets = [0, 0], sizes = [8, 32], strides = [1, 1]} : vector<8x128xf32> to vector<8x32xf32>
    %218 = vector.extract_strided_slice %216 {offsets = [0, 32], sizes = [8, 32], strides = [1, 1]} : vector<8x128xf32> to vector<8x32xf32>
    %219 = vector.extract_strided_slice %216 {offsets = [0, 64], sizes = [8, 32], strides = [1, 1]} : vector<8x128xf32> to vector<8x32xf32>
    %cst_55 = arith.constant 2.000000e+00 : f32
    %220 = vector.broadcast %cst_55 : f32 to vector<8x32xf32>
    %221 = arith.mulf %220, %219 : vector<8x32xf32>
    %cst_56 = arith.constant 1.000000e+00 : f32
    %222 = vector.broadcast %cst_56 : f32 to vector<8x32xf32>
    %223 = arith.subf %221, %222 : vector<8x32xf32>
    %224 = vector.extract_strided_slice %216 {offsets = [0, 96], sizes = [8, 32], strides = [1, 1]} : vector<8x128xf32> to vector<8x32xf32>
    %225 = arith.mulf %218, %184 : vector<8x32xf32>
    %226 = arith.mulf %217, %223 : vector<8x32xf32>
    %227 = arith.addf %225, %226 : vector<8x32xf32>
    %228 = math.tanh %227 : vector<8x32xf32>
    %229 = arith.mulf %224, %228 : vector<8x32xf32>
    %230 = tpu.concatenate %186, %208 in 1 : vector<8x32xf32>, vector<8x32xf32> -> vector<8x64xf32>
    %cst_57 = arith.constant dense<0.000000e+00> : vector<8x128xf32>
    %231 = tpu.matmul %230, %9, %cst_57 {dimension_numbers = #tpu.dot_dimension_numbers<[1], [0], [0], [1], [0, 0, 1, 1], [], []>} : vector<8x64xf32>, vector<64x128xf32>, vector<8x128xf32> -> vector<8x128xf32>
    %232 = vector.broadcast %11 : vector<1x128xf32> to vector<8x128xf32>
    %233 = arith.addf %231, %232 : vector<8x128xf32>
    %234 = arith.negf %233 : vector<8x128xf32>
    %235 = math.exp %234 : vector<8x128xf32>
    %cst_58 = arith.constant 1.000000e+00 : f32
    %236 = vector.broadcast %cst_58 : f32 to vector<8x128xf32>
    %237 = arith.addf %236, %235 : vector<8x128xf32>
    %238 = arith.divf %236, %237 : vector<8x128xf32>
    %239 = vector.extract_strided_slice %238 {offsets = [0, 0], sizes = [8, 32], strides = [1, 1]} : vector<8x128xf32> to vector<8x32xf32>
    %240 = vector.extract_strided_slice %238 {offsets = [0, 32], sizes = [8, 32], strides = [1, 1]} : vector<8x128xf32> to vector<8x32xf32>
    %241 = vector.extract_strided_slice %238 {offsets = [0, 64], sizes = [8, 32], strides = [1, 1]} : vector<8x128xf32> to vector<8x32xf32>
    %cst_59 = arith.constant 2.000000e+00 : f32
    %242 = vector.broadcast %cst_59 : f32 to vector<8x32xf32>
    %243 = arith.mulf %242, %241 : vector<8x32xf32>
    %cst_60 = arith.constant 1.000000e+00 : f32
    %244 = vector.broadcast %cst_60 : f32 to vector<8x32xf32>
    %245 = arith.subf %243, %244 : vector<8x32xf32>
    %246 = vector.extract_strided_slice %238 {offsets = [0, 96], sizes = [8, 32], strides = [1, 1]} : vector<8x128xf32> to vector<8x32xf32>
    %247 = arith.mulf %240, %206 : vector<8x32xf32>
    %248 = arith.mulf %239, %245 : vector<8x32xf32>
    %249 = arith.addf %247, %248 : vector<8x32xf32>
    %250 = math.tanh %249 : vector<8x32xf32>
    %251 = arith.mulf %246, %250 : vector<8x32xf32>
    %252 = vector.extract_strided_slice %6 {offsets = [48, 0], sizes = [8, 128], strides = [1, 1]} : vector<64x128xf32> to vector<8x128xf32>
    %cst_61 = arith.constant dense<0.000000e+00> : vector<8x128xf32>
    %253 = tpu.matmul %229, %7, %cst_61 {dimension_numbers = #tpu.dot_dimension_numbers<[1], [0], [0], [1], [0, 0, 1, 1], [], []>} : vector<8x32xf32>, vector<32x128xf32>, vector<8x128xf32> -> vector<8x128xf32>
    %254 = arith.addf %252, %253 : vector<8x128xf32>
    %255 = arith.negf %254 : vector<8x128xf32>
    %256 = math.exp %255 : vector<8x128xf32>
    %cst_62 = arith.constant 1.000000e+00 : f32
    %257 = vector.broadcast %cst_62 : f32 to vector<8x128xf32>
    %258 = arith.addf %257, %256 : vector<8x128xf32>
    %259 = arith.divf %257, %258 : vector<8x128xf32>
    %260 = vector.extract_strided_slice %259 {offsets = [0, 0], sizes = [8, 32], strides = [1, 1]} : vector<8x128xf32> to vector<8x32xf32>
    %261 = vector.extract_strided_slice %259 {offsets = [0, 32], sizes = [8, 32], strides = [1, 1]} : vector<8x128xf32> to vector<8x32xf32>
    %262 = vector.extract_strided_slice %259 {offsets = [0, 64], sizes = [8, 32], strides = [1, 1]} : vector<8x128xf32> to vector<8x32xf32>
    %cst_63 = arith.constant 2.000000e+00 : f32
    %263 = vector.broadcast %cst_63 : f32 to vector<8x32xf32>
    %264 = arith.mulf %263, %262 : vector<8x32xf32>
    %cst_64 = arith.constant 1.000000e+00 : f32
    %265 = vector.broadcast %cst_64 : f32 to vector<8x32xf32>
    %266 = arith.subf %264, %265 : vector<8x32xf32>
    %267 = vector.extract_strided_slice %259 {offsets = [0, 96], sizes = [8, 32], strides = [1, 1]} : vector<8x128xf32> to vector<8x32xf32>
    %268 = arith.mulf %261, %227 : vector<8x32xf32>
    %269 = arith.mulf %260, %266 : vector<8x32xf32>
    %270 = arith.addf %268, %269 : vector<8x32xf32>
    %271 = math.tanh %270 : vector<8x32xf32>
    %272 = arith.mulf %267, %271 : vector<8x32xf32>
    %273 = tpu.concatenate %229, %251 in 1 : vector<8x32xf32>, vector<8x32xf32> -> vector<8x64xf32>
    %cst_65 = arith.constant dense<0.000000e+00> : vector<8x128xf32>
    %274 = tpu.matmul %273, %9, %cst_65 {dimension_numbers = #tpu.dot_dimension_numbers<[1], [0], [0], [1], [0, 0, 1, 1], [], []>} : vector<8x64xf32>, vector<64x128xf32>, vector<8x128xf32> -> vector<8x128xf32>
    %275 = vector.broadcast %11 : vector<1x128xf32> to vector<8x128xf32>
    %276 = arith.addf %274, %275 : vector<8x128xf32>
    %277 = arith.negf %276 : vector<8x128xf32>
    %278 = math.exp %277 : vector<8x128xf32>
    %cst_66 = arith.constant 1.000000e+00 : f32
    %279 = vector.broadcast %cst_66 : f32 to vector<8x128xf32>
    %280 = arith.addf %279, %278 : vector<8x128xf32>
    %281 = arith.divf %279, %280 : vector<8x128xf32>
    %282 = vector.extract_strided_slice %281 {offsets = [0, 0], sizes = [8, 32], strides = [1, 1]} : vector<8x128xf32> to vector<8x32xf32>
    %283 = vector.extract_strided_slice %281 {offsets = [0, 32], sizes = [8, 32], strides = [1, 1]} : vector<8x128xf32> to vector<8x32xf32>
    %284 = vector.extract_strided_slice %281 {offsets = [0, 64], sizes = [8, 32], strides = [1, 1]} : vector<8x128xf32> to vector<8x32xf32>
    %cst_67 = arith.constant 2.000000e+00 : f32
    %285 = vector.broadcast %cst_67 : f32 to vector<8x32xf32>
    %286 = arith.mulf %285, %284 : vector<8x32xf32>
    %cst_68 = arith.constant 1.000000e+00 : f32
    %287 = vector.broadcast %cst_68 : f32 to vector<8x32xf32>
    %288 = arith.subf %286, %287 : vector<8x32xf32>
    %289 = vector.extract_strided_slice %281 {offsets = [0, 96], sizes = [8, 32], strides = [1, 1]} : vector<8x128xf32> to vector<8x32xf32>
    %290 = arith.mulf %283, %249 : vector<8x32xf32>
    %291 = arith.mulf %282, %288 : vector<8x32xf32>
    %292 = arith.addf %290, %291 : vector<8x32xf32>
    %293 = math.tanh %292 : vector<8x32xf32>
    %294 = arith.mulf %289, %293 : vector<8x32xf32>
    %295 = vector.extract_strided_slice %6 {offsets = [56, 0], sizes = [8, 128], strides = [1, 1]} : vector<64x128xf32> to vector<8x128xf32>
    %cst_69 = arith.constant dense<0.000000e+00> : vector<8x128xf32>
    %296 = tpu.matmul %272, %7, %cst_69 {dimension_numbers = #tpu.dot_dimension_numbers<[1], [0], [0], [1], [0, 0, 1, 1], [], []>} : vector<8x32xf32>, vector<32x128xf32>, vector<8x128xf32> -> vector<8x128xf32>
    %297 = arith.addf %295, %296 : vector<8x128xf32>
    %298 = arith.negf %297 : vector<8x128xf32>
    %299 = math.exp %298 : vector<8x128xf32>
    %cst_70 = arith.constant 1.000000e+00 : f32
    %300 = vector.broadcast %cst_70 : f32 to vector<8x128xf32>
    %301 = arith.addf %300, %299 : vector<8x128xf32>
    %302 = arith.divf %300, %301 : vector<8x128xf32>
    %303 = vector.extract_strided_slice %302 {offsets = [0, 0], sizes = [8, 32], strides = [1, 1]} : vector<8x128xf32> to vector<8x32xf32>
    %304 = vector.extract_strided_slice %302 {offsets = [0, 32], sizes = [8, 32], strides = [1, 1]} : vector<8x128xf32> to vector<8x32xf32>
    %305 = vector.extract_strided_slice %302 {offsets = [0, 64], sizes = [8, 32], strides = [1, 1]} : vector<8x128xf32> to vector<8x32xf32>
    %cst_71 = arith.constant 2.000000e+00 : f32
    %306 = vector.broadcast %cst_71 : f32 to vector<8x32xf32>
    %307 = arith.mulf %306, %305 : vector<8x32xf32>
    %cst_72 = arith.constant 1.000000e+00 : f32
    %308 = vector.broadcast %cst_72 : f32 to vector<8x32xf32>
    %309 = arith.subf %307, %308 : vector<8x32xf32>
    %310 = vector.extract_strided_slice %302 {offsets = [0, 96], sizes = [8, 32], strides = [1, 1]} : vector<8x128xf32> to vector<8x32xf32>
    %311 = arith.mulf %304, %270 : vector<8x32xf32>
    %312 = arith.mulf %303, %309 : vector<8x32xf32>
    %313 = arith.addf %311, %312 : vector<8x32xf32>
    %314 = math.tanh %313 : vector<8x32xf32>
    %315 = arith.mulf %310, %314 : vector<8x32xf32>
    %316 = tpu.concatenate %272, %294 in 1 : vector<8x32xf32>, vector<8x32xf32> -> vector<8x64xf32>
    %cst_73 = arith.constant dense<0.000000e+00> : vector<8x128xf32>
    %317 = tpu.matmul %316, %9, %cst_73 {dimension_numbers = #tpu.dot_dimension_numbers<[1], [0], [0], [1], [0, 0, 1, 1], [], []>} : vector<8x64xf32>, vector<64x128xf32>, vector<8x128xf32> -> vector<8x128xf32>
    %318 = vector.broadcast %11 : vector<1x128xf32> to vector<8x128xf32>
    %319 = arith.addf %317, %318 : vector<8x128xf32>
    %320 = arith.negf %319 : vector<8x128xf32>
    %321 = math.exp %320 : vector<8x128xf32>
    %cst_74 = arith.constant 1.000000e+00 : f32
    %322 = vector.broadcast %cst_74 : f32 to vector<8x128xf32>
    %323 = arith.addf %322, %321 : vector<8x128xf32>
    %324 = arith.divf %322, %323 : vector<8x128xf32>
    %325 = vector.extract_strided_slice %324 {offsets = [0, 0], sizes = [8, 32], strides = [1, 1]} : vector<8x128xf32> to vector<8x32xf32>
    %326 = vector.extract_strided_slice %324 {offsets = [0, 32], sizes = [8, 32], strides = [1, 1]} : vector<8x128xf32> to vector<8x32xf32>
    %327 = vector.extract_strided_slice %324 {offsets = [0, 64], sizes = [8, 32], strides = [1, 1]} : vector<8x128xf32> to vector<8x32xf32>
    %cst_75 = arith.constant 2.000000e+00 : f32
    %328 = vector.broadcast %cst_75 : f32 to vector<8x32xf32>
    %329 = arith.mulf %328, %327 : vector<8x32xf32>
    %cst_76 = arith.constant 1.000000e+00 : f32
    %330 = vector.broadcast %cst_76 : f32 to vector<8x32xf32>
    %331 = arith.subf %329, %330 : vector<8x32xf32>
    %332 = vector.extract_strided_slice %324 {offsets = [0, 96], sizes = [8, 32], strides = [1, 1]} : vector<8x128xf32> to vector<8x32xf32>
    %333 = arith.mulf %326, %292 : vector<8x32xf32>
    %334 = arith.mulf %325, %331 : vector<8x32xf32>
    %335 = arith.addf %333, %334 : vector<8x32xf32>
    %336 = math.tanh %335 : vector<8x32xf32>
    %337 = arith.mulf %332, %336 : vector<8x32xf32>
    %338 = tpu.concatenate %315, %337 in 1 : vector<8x32xf32>, vector<8x32xf32> -> vector<8x64xf32>
    %cst_77 = arith.constant dense<0.000000e+00> : vector<8x128xf32>
    %339 = tpu.matmul %338, %9, %cst_77 {dimension_numbers = #tpu.dot_dimension_numbers<[1], [0], [0], [1], [0, 0, 1, 1], [], []>} : vector<8x64xf32>, vector<64x128xf32>, vector<8x128xf32> -> vector<8x128xf32>
    %340 = vector.broadcast %11 : vector<1x128xf32> to vector<8x128xf32>
    %341 = arith.addf %339, %340 : vector<8x128xf32>
    %342 = arith.negf %341 : vector<8x128xf32>
    %343 = math.exp %342 : vector<8x128xf32>
    %cst_78 = arith.constant 1.000000e+00 : f32
    %344 = vector.broadcast %cst_78 : f32 to vector<8x128xf32>
    %345 = arith.addf %344, %343 : vector<8x128xf32>
    %346 = arith.divf %344, %345 : vector<8x128xf32>
    %347 = vector.extract_strided_slice %346 {offsets = [0, 0], sizes = [8, 32], strides = [1, 1]} : vector<8x128xf32> to vector<8x32xf32>
    %348 = vector.extract_strided_slice %346 {offsets = [0, 32], sizes = [8, 32], strides = [1, 1]} : vector<8x128xf32> to vector<8x32xf32>
    %349 = vector.extract_strided_slice %346 {offsets = [0, 64], sizes = [8, 32], strides = [1, 1]} : vector<8x128xf32> to vector<8x32xf32>
    %cst_79 = arith.constant 2.000000e+00 : f32
    %350 = vector.broadcast %cst_79 : f32 to vector<8x32xf32>
    %351 = arith.mulf %350, %349 : vector<8x32xf32>
    %cst_80 = arith.constant 1.000000e+00 : f32
    %352 = vector.broadcast %cst_80 : f32 to vector<8x32xf32>
    %353 = arith.subf %351, %352 : vector<8x32xf32>
    %354 = vector.extract_strided_slice %346 {offsets = [0, 96], sizes = [8, 32], strides = [1, 1]} : vector<8x128xf32> to vector<8x32xf32>
    %355 = arith.mulf %348, %335 : vector<8x32xf32>
    %356 = arith.mulf %347, %353 : vector<8x32xf32>
    %357 = arith.addf %355, %356 : vector<8x32xf32>
    %358 = math.tanh %357 : vector<8x32xf32>
    %359 = arith.mulf %354, %358 : vector<8x32xf32>
    %c0_81 = arith.constant 0 : index
    %c0_82 = arith.constant 0 : index
    %360 = vector.load %arg5[%c0_81, %c0_82] : memref<32x128xf32, #tpu.memory_space<vmem>>, vector<32x128xf32>
    %cst_83 = arith.constant dense<0.000000e+00> : vector<8x128xf32>
    %361 = tpu.matmul %359, %360, %cst_83 {dimension_numbers = #tpu.dot_dimension_numbers<[1], [0], [0], [1], [0, 0, 1, 1], [], []>} : vector<8x32xf32>, vector<32x128xf32>, vector<8x128xf32> -> vector<8x128xf32>
    %c0_84 = arith.constant 0 : index
    %c0_85 = arith.constant 0 : index
    %362 = vector.load %arg6[%c0_84, %c0_85] : memref<1x128xf32, #tpu.memory_space<vmem>>, vector<1x128xf32>
    %363 = vector.broadcast %362 : vector<1x128xf32> to vector<8x128xf32>
    %364 = arith.addf %361, %363 : vector<8x128xf32>
    %c0_86 = arith.constant 0 : index
    %c0_87 = arith.constant 0 : index
    %365 = vector.load %arg7[%c0_86, %c0_87] : memref<8x128xf32, #tpu.memory_space<vmem>>, vector<8x128xf32>
    tpu.vector_store %arg7[%c0_86, %c0_87], %364 {strides = array<i32>} : memref<8x128xf32, #tpu.memory_space<vmem>>, vector<8x128xf32>,
    return
  }
}

</mosaic_0001>

<bundles_post_ra>
// kernel: forward.1
= control target key start
LH: loop header
LB: loop body
LE: loop exit
PB: predicated region body
PF: predicated region fallthrough
CT: control target
= control target key end

     0   :  { %vm42_vm0 = vcmask 64512   ;;  %v2624_v0 = vmov 0.0|0.0   ;;  %vm2625_vm1 = vmmov 0   ;;  %v2626_v4 = vmov 0.0   ;;  %s2627_s15 = smov 64   ;;  %s2628_s16 = smov 32   ;;  %s3074_s2 = inlined_call_operand.vmem [shape: f32[32,128], index: 2, kind: input, shape index: {}]   ;;  %s3075_s1 = inlined_call_operand.vmem [shape: f32[8,128], index: 1, kind: input, shape index: {}]   ;;  %s3076_s0 = inlined_call_operand.vmem [shape: f32[64,8], index: 0, kind: input, shape index: {}]   ;;  %s3077_s4 = inlined_call_operand.vmem [shape: f32[2,1,128], index: 4, kind: input, shape index: {}]   ;;  %s3078_s3 = inlined_call_operand.vmem [shape: f32[1,64,128], index: 3, kind: input, shape index: {}]   ;;  %s3079_s5 = inlined_call_operand.vmem [shape: f32[32,128], index: 5, kind: input, shape index: {}]   ;;  %s3080_s6 = inlined_call_operand.vmem [shape: f32[1,128], index: 6, kind: input, shape index: {}]   ;;  %s3081_s7 = inlined_call_operand.vmem [shape: f32[8,128], index: 7, kind: output, shape index: {}]  }
   0x1   :  { %2373 = vmatprep.subr.bf16.mxu1 %v2624_v0  ;;  %v172_v1 = vld [vmem:[%s3074_s2] sm:$0xff]  ;;  %v173_v2 = vld [vmem:[%s3074_s2 + $0x8] sm:$0xff]  ;;  %2130 = vmatprep.mubr.msk.f32.mxu1 %vm2625_vm1, %v2626_v4  ;;  %v174_v8 = vld [vmem:[%s3074_s2 + $0x10] sm:$0xff]  ;;  %vm186_vm2 = vcmask 261120   ;;  %vm395_vm3 = vcmask 523264  }
   0x2   :  { %v34_v3 = vld [vmem:[%s3075_s1] sm:$0xff]  ;;  %v2681_v5 = vpack.c.bf16 %v173_v2, %v172_v1  ;;  %v27_v7 = vld [vmem:[%s3076_s0 + $0x8] sm:$0xff]  ;;  %v175_v9 = vld [vmem:[%s3074_s2 + $0x18] sm:$0xff] }
   0x3   :  { %2108 = vmatprep.subr.mxu0 %v34_v3  ;;  %v26_v6 = vld [vmem:[%s3076_s0] sm:$0xff]  ;;  %v2698_v10 = vpack.c.bf16 %v175_v9, %v174_v8  ;;  %v28_v29 = vld [vmem:[%s3076_s0 + $0x10] sm:$0xff]  ;;  %v29_v30 = vld [vmem:[%s3076_s0 + $0x18] sm:$0xff] }
   0x4   :  { %2109 = vmatpush3.msra.mxu0 %v34_v3  ;;  %2110 = vmatprep.mubr.msk.f32.mxu0 %vm42_vm0, %v26_v6  ;;  %v2716_v12 = vld [vmem:[%s3077_s4] ss:$0 sm:$0xff]  ;;  %v177_v33 = vld [vmem:[%s3078_s3 + $0x8] sm:$0xff]  ;;  %v178_v34 = vld [vmem:[%s3078_s3 + $0x10] sm:$0xff] }
   0x5   :  { %2375 = vmatpush3.bf16.msra.mxu1 %v2681_v5  ;;  %2111 = vmatmul.mubr.msk.f32.vlgmr.msra.gmra.mrb[0].mxu0 %vm42_vm0, %v27_v7  ;;  %v30_v31 = vld [vmem:[%s3076_s0 + $0x20] sm:$0xff]  ;;  %v179_v36 = vld [vmem:[%s3078_s3 + $0x18] sm:$0xff]  ;;  %v31_v37 = vld [vmem:[%s3076_s0 + $0x28] sm:$0xff] }
   0x6   :  { %2376 = vmatprep.subr.bf16.mxu1 %v2624_v0  ;;  %2385 = vmatprep.subr.bf16.mxu0 %v2624_v0  ;;  %v176_v32 = vld [vmem:[%s3078_s3] sm:$0xff]  ;;  %v2754_v38 = vpack.c.bf16 %v179_v36, %v178_v34  ;;  %v32_v39 = vld [vmem:[%s3076_s0 + $0x30] sm:$0xff]  ;;  %v181_v41 = vld [vmem:[%s3078_s3 + $0x28] sm:$0xff] }
   0x7   :  { %2113 = vmatprep.mubr.msk.f32.mxu0 %vm42_vm0, %v28_v29  ;;  %v2743_v35 = vpack.c.bf16 %v177_v33, %v176_v32  ;;  %v180_v40 = vld [vmem:[%s3078_s3 + $0x20] sm:$0xff]  ;;  %v33_v42 = vld [vmem:[%s3076_s0 + $0x38] sm:$0xff]  ;;  %v182_v44 = vld [vmem:[%s3078_s3 + $0x30] sm:$0xff] }
   0x8   :  { %v2772_v43 = vpack.c.bf16 %v181_v41, %v180_v40  ;;  %v183_v45 = vld [vmem:[%s3078_s3 + $0x38] sm:$0xff]  ;;  %v2828_v59 = vld [vmem:[%s3077_s4 + $0x1] ss:$0 sm:$0xff] }
   0x9   :  { %2378 = vmatpush3.bf16.msra.mxu1 %v2698_v10  ;;  %2114 = vmatmul.mubr.msk.f32.gmra.mrb[2].mxu0 %vm42_vm0, %v29_v30  ;;  %v2786_v47 = vpack.c.bf16 %v183_v45, %v182_v44 }
   0xa   :  { %2379 = vmatprep.subr.bf16.mxu1 %v2624_v0  ;;  %2116 = vmatprep.mubr.msk.f32.mxu0 %vm42_vm0, %v30_v31 }
   0xb   :  { %2387 = vmatpush3.bf16.msra.mxu0 %v2743_v35 }
   0xc   :  { %2131 = vmatmul.mubr.f32.vlgmr.msra.gmra.mrb[0].mxu1 %v2626_v4  ;;  %2388 = vmatprep.subr.bf16.mxu0 %v2624_v0 }
   0xd   :  { %2381 = vmatpush3.bf16.msra.mxu1 %v2681_v5  ;;  %2141 = vmatprep.mubr.msk.f32.mxu1 %vm2625_vm1, %v2626_v4 }
   0xe   :  { %2382 = vmatprep.subr.bf16.mxu1 %v2624_v0  ;;  %2117 = vmatmul.mubr.msk.f32.gmra.mrb[4].mxu0 %vm42_vm0, %v31_v37 }
   0xf   :  { %2119 = vmatprep.mubr.msk.f32.mxu0 %vm42_vm0, %v32_v39  ;;  %2390 = vmatpush3.bf16.msra.mxu0 %v2754_v38 }
  0x10   :  { %2391 = vmatprep.subr.bf16.mxu0 %v2624_v0 }
  0x11   :  { %2384 = vmatpush3.bf16.msra.mxu1 %v2698_v10 }
  0x12   :  { %2397 = vmatprep.subr.bf16.mxu1 %v2624_v0  ;;  %2120 = vmatmul.mubr.msk.f32.gmra.mrb[6].mxu0 %vm42_vm0, %v33_v42 }
  0x13   :  { %2160 = vmatprep.mubr.msk.f32.mxu0 %vm2625_vm1, %v2626_v4  ;;  %2393 = vmatpush3.bf16.msra.mxu0 %v2772_v43 }
  0x14   :  { %2394 = vmatprep.subr.bf16.mxu0 %v2624_v0 }
  0x17   :  { %2396 = vmatpush3.bf16.msra.mxu0 %v2786_v47 }
  0x18   :  { %2403 = vmatprep.subr.bf16.mxu0 %v2624_v0 }
  0xd8   :  { %v2711_v11 = vpop.f32.mrb[0].mxu0 }
  0xd9   :  { %v133_v13 = vpop.f32.mrb[1].mxu0  ;;  %v139_v58 = vadd.f32 %v2711_v11, %v2716_v12 }
  0xda   :  { %v134_v14 = vadd.f32 %v2716_v12, %v133_v13 }
  0xdc   :  { %v2792_v50 = vpop.f32.mrb[2].mxu0 }
  0xdd   :  { %v2794_v51 = vpop.f32.mrb[3].mxu0 }
  0xde   :  { %v144_v40 = vadd.f32 %v2716_v12, %v2794_v51 }
  0xdf   :  { %v256_v15 = vpop.f32.mrb[0].mxu1 }
  0xe0   :  { %v260_v16 = vadd.f32 %v256_v15, %v134_v14  ;;  %v2132_v17 = vpop.f32.mrb[1].mxu1 }
  0xe1   :  { %v2796_v52 = vpop.f32.mrb[4].mxu0 }
  0xe2   :  { %v1932_v18 = vmul.f32 -1.442695, %v260_v16  ;;  %v2798_v53 = vpop.f32.mrb[5].mxu0 }
  0xe4   :  { %2528 = vpow2.f32 %v1932_v18 }
  0xe5   :  { %v2800_v54 = vpop.f32.mrb[6].mxu0 }
  0xe6   :  { %v2802_v55 = vpop.f32.mrb[7].mxu0 }
  0xee   :  { %v2529_v19 = vpop.eup %2528 }
  0xef   :  { %v264_v20 = vadd.f32 1.0, %v2529_v19 }
  0xf1   :  { %2530 = vrcp.f32 %v264_v20 }
  0xfb   :  { %v2531_v21 = vpop.eup %2530 }
  0xfc   :  { %v267_v22 = vmul.f32 2.0, %v2531_v21  ;;  %v269_v26 = vmul.f32 0.0, %v2531_v21 }
  0xfe   :  { %v1933_v23 = vadd.f32 -1.0, %v267_v22 }
 0x100   :  { %271 = vrot.lane.b32.xlu0 %v1933_v23, %s2627_s15 }
 0x172   :  { %v272_v24 = vpop.permute.xlu0 %271 }
 0x173   :  { %v274_v25 = vmul.f32 %v2531_v21, %v272_v24 }
 0x175   :  { %276 = vrot.lane.b32.xlu0 %v274_v25, %s2628_s16 }
 0x1e7   :  { %v277_v27 = vpop.permute.xlu0 %276 }
 0x1e8   :  { %v2721_v28 = vadd.f32 %v277_v27, %v269_v26 }
 0x1ea   :  { %2532 = vtanh.f32 %v2721_v28 }
 0x1f4   :  { %v2533_v46 = vpop.eup %2532 }
 0x1f5   :  { %282 = vrot.lane.b32.xlu1 %v2533_v46, %s2627_s15 }
 0x267   :  { %v283_v48 = vpop.permute.xlu1 %282 }
 0x268   :  { %v285_v49 = vmul.f32 %v2531_v21, %v283_v48 }
 0x26a   :  { %287 = vrot.lane.b32.xlu1 %v285_v49, %s2628_s16 }
 0x2dc   :  { %v288_v56 = vpop.permute.xlu1 %287 }
 0x2dd   :  { %v388_v57 = vsel %vm186_vm2, %v288_v56, 0.0  ;;  %2142 = vmatmul.mubr.msk.f32.vlgmr.msra.gmra.mrb[2].mxu1 %vm186_vm2, %v288_v56 }
 0x2de   :  { %2161 = vmatmul.mubr.msk.f32.vlgmr.msra.gmra.mrb[8].mxu0 %vm395_vm3, %v388_v57  ;;  %2399 = vmatpush3.bf16.msra.mxu1 %v2681_v5 }
 0x2df   :  { %2405 = vmatpush3.bf16.msra.mxu0 %v2743_v35  ;;  %2400 = vmatprep.subr.bf16.mxu1 %v2624_v0 }
 0x2e0   :  { %2406 = vmatprep.subr.bf16.mxu0 %v2624_v0  ;;  %2171 = vmatprep.mubr.msk.f32.mxu1 %vm2625_vm1, %v2626_v4 }
 0x2e1   :  { %2190 = vmatprep.mubr.msk.f32.mxu0 %vm2625_vm1, %v2626_v4 }
 0x2e2   :  { %2402 = vmatpush3.bf16.msra.mxu1 %v2698_v10 }
 0x2e3   :  { %2408 = vmatpush3.bf16.msra.mxu0 %v2754_v38  ;;  %2415 = vmatprep.subr.bf16.mxu1 %v2624_v0 }
 0x2e4   :  { %2409 = vmatprep.subr.bf16.mxu0 %v2624_v0 }
 0x2e7   :  { %2411 = vmatpush3.bf16.msra.mxu0 %v2772_v43 }
 0x2e8   :  { %2412 = vmatprep.subr.bf16.mxu0 %v2624_v0 }
 0x2eb   :  { %2414 = vmatpush3.bf16.msra.mxu0 %v2786_v47 }
 0x2ec   :  { %2433 = vmatprep.subr.bf16.mxu0 %v2624_v0 }
 0x3b0   :  { %v357_v60 = vpop.f32.mrb[2].mxu1 }
 0x3b1   :  { %v361_v61 = vadd.f32 %v357_v60, %v139_v58  ;;  %v2143_v62 = vpop.f32.mrb[3].mxu1  ;;  %v465_v63 = vpop.f32.mrb[8].mxu0 }
 0x3b2   :  { %v466_v1 = vadd.f32 %v2828_v59, %v465_v63  ;;  %v2162_v2 = vpop.f32.mrb[9].mxu0 }
 0x3b3   :  { %v1935_v3 = vmul.f32 -1.442695, %v361_v61 }
 0x3b4   :  { %v1939_v6 = vmul.f32 -1.442695, %v466_v1 }
 0x3b5   :  { %2534 = vpow2.f32 %v1935_v3 }
 0x3b6   :  { %2536 = vpow2.f32 %v1939_v6 }
 0x3bf   :  { %v2535_v7 = vpop.eup %2534 }
 0x3c0   :  { %v2537_v8 = vpop.eup %2536  ;;  %v365_v9 = vadd.f32 1.0, %v2535_v7 }
 0x3c1   :  { %v472_v11 = vadd.f32 1.0, %v2537_v8 }
 0x3c2   :  { %2538 = vrcp.f32 %v365_v9 }
 0x3c3   :  { %2540 = vrcp.f32 %v472_v11 }
 0x3cc   :  { %v2539_v13 = vpop.eup %2538 }
 0x3cd   :  { %v2541_v14 = vpop.eup %2540  ;;  %v368_v15 = vmul.f32 2.0, %v2539_v13  ;;  %v370_v23 = vmul.f32 %v2539_v13, %v2721_v28 }
 0x3ce   :  { %v475_v16 = vmul.f32 2.0, %v2541_v14  ;;  %v477_v25 = vmul.f32 0.0, %v2541_v14 }
 0x3cf   :  { %v1936_v17 = vadd.f32 -1.0, %v368_v15 }
 0x3d0   :  { %v1940_v18 = vadd.f32 -1.0, %v475_v16 }
 0x3d1   :  { %372 = vrot.lane.b32.xlu0 %v1936_v17, %s2627_s15 }
 0x3d2   :  { %479 = vrot.lane.b32.xlu1 %v1940_v18, %s2627_s15 }
 0x443   :  { %v373_v19 = vpop.permute.xlu0 %372 }
 0x444   :  { %v375_v20 = vmul.f32 %v2539_v13, %v373_v19  ;;  %v480_v21 = vpop.permute.xlu1 %479 }
 0x445   :  { %v482_v22 = vmul.f32 %v2541_v14, %v480_v21 }
 0x446   :  { %377 = vrot.lane.b32.xlu0 %v375_v20, %s2628_s16 }
 0x447   :  { %484 = vrot.lane.b32.xlu1 %v482_v22, %s2628_s16 }
 0x4b8   :  { %v378_v24 = vpop.permute.xlu0 %377 }
 0x4b9   :  { %v380_v26 = vadd.f32 %v378_v24, %v370_v23  ;;  %v485_v27 = vpop.permute.xlu1 %484 }
 0x4ba   :  { %v487_v29 = vadd.f32 %v485_v27, %v477_v25  ;;  %v149_v27 = vadd.f32 %v2792_v50, %v2716_v12 }
 0x4bb   :  { %2542 = vtanh.f32 %v380_v26 }
 0x4bc   :  { %2544 = vtanh.f32 %v487_v29 }
 0x4c5   :  { %v2543_v30 = vpop.eup %2542 }
 0x4c6   :  { %v2545_v31 = vpop.eup %2544  ;;  %383 = vrot.lane.b32.xlu0 %v2543_v30, %s2627_s15 }
 0x4c7   :  { %490 = vrot.lane.b32.xlu1 %v2545_v31, %s2627_s15 }
 0x538   :  { %v384_v32 = vpop.permute.xlu0 %383 }
 0x539   :  { %v386_v33 = vmul.f32 %v2539_v13, %v384_v32  ;;  %v491_v34 = vpop.permute.xlu1 %490 }
 0x53a   :  { %v493_v36 = vmul.f32 %v2541_v14, %v491_v34 }
 0x53b   :  { %495 = vrot.lane.b32.xlu0 %v386_v33, %s2628_s16 }
 0x53c   :  { %597 = vrot.lane.b32.xlu1 %v493_v36, %s2627_s15 }
 0x5ad   :  { %v496_v28 = vpop.permute.xlu0 %495 }
 0x5ae   :  { %2172 = vmatmul.mubr.msk.f32.vlgmr.msra.gmra.mrb[4].mxu1 %vm186_vm2, %v496_v28  ;;  %v598_v37 = vpop.permute.xlu1 %597 }
 0x5af   :  { %v600_v39 = vsel %vm186_vm2, %v496_v28, %v598_v37  ;;  %2417 = vmatpush3.bf16.msra.mxu1 %v2681_v5  ;;  %2201 = vmatprep.mubr.msk.f32.mxu1 %vm2625_vm1, %v2626_v4 }
 0x5b0   :  { %2191 = vmatmul.mubr.msk.f32.vlgmr.msra.gmra.mrb[10].mxu0 %vm395_vm3, %v600_v39  ;;  %2418 = vmatprep.subr.bf16.mxu1 %v2624_v0 }
 0x5b1   :  { %2435 = vmatpush3.bf16.msra.mxu0 %v2681_v5  ;;  %2231 = vmatprep.mubr.msk.f32.mxu0 %vm2625_vm1, %v2626_v4 }
 0x5b2   :  { %2436 = vmatprep.subr.bf16.mxu0 %v2624_v0 }
 0x5b3   :  { %2420 = vmatpush3.bf16.msra.mxu1 %v2698_v10 }
 0x5b4   :  { %2421 = vmatprep.subr.bf16.mxu1 %v2624_v0 }
 0x5b5   :  { %2438 = vmatpush3.bf16.msra.mxu0 %v2698_v10 }
 0x5b6   :  { %2439 = vmatprep.subr.bf16.mxu0 %v2624_v0 }
 0x681   :  { %v565_v41 = vpop.f32.mrb[4].mxu1 }
 0x682   :  { %v569_v42 = vadd.f32 %v565_v41, %v144_v40  ;;  %v2173_v44 = vpop.f32.mrb[5].mxu1 }
 0x683   :  { %v670_v45 = vpop.f32.mrb[10].mxu0 }
 0x684   :  { %v1942_v46 = vmul.f32 -1.442695, %v569_v42  ;;  %v671_v48 = vadd.f32 %v2828_v59, %v670_v45  ;;  %v2192_v49 = vpop.f32.mrb[11].mxu0 }
 0x686   :  { %2546 = vpow2.f32 %v1942_v46  ;;  %v1945_v56 = vmul.f32 -1.442695, %v671_v48 }
 0x688   :  { %2548 = vpow2.f32 %v1945_v56 }
 0x690   :  { %v2547_v57 = vpop.eup %2546 }
 0x691   :  { %v573_v58 = vadd.f32 1.0, %v2547_v57 }
 0x692   :  { %v2549_v60 = vpop.eup %2548 }
 0x693   :  { %2550 = vrcp.f32 %v573_v58  ;;  %v677_v61 = vadd.f32 1.0, %v2549_v60 }
 0x695   :  { %2552 = vrcp.f32 %v677_v61 }
 0x69d   :  { %v2551_v62 = vpop.eup %2550 }
 0x69e   :  { %v576_v63 = vmul.f32 2.0, %v2551_v62  ;;  %v578_v11 = vmul.f32 %v2551_v62, %v380_v26 }
 0x69f   :  { %v2553_v51 = vpop.eup %2552 }
 0x6a0   :  { %v1943_v1 = vadd.f32 -1.0, %v576_v63  ;;  %v680_v2 = vmul.f32 2.0, %v2553_v51  ;;  %v682_v15 = vmul.f32 %v2553_v51, %v487_v29 }
 0x6a2   :  { %580 = vrot.lane.b32.xlu0 %v1943_v1, %s2627_s15  ;;  %v1946_v3 = vadd.f32 -1.0, %v680_v2 }
 0x6a4   :  { %684 = vrot.lane.b32.xlu1 %v1946_v3, %s2627_s15 }
 0x714   :  { %v581_v6 = vpop.permute.xlu0 %580 }
 0x715   :  { %v583_v7 = vmul.f32 %v2551_v62, %v581_v6 }
 0x716   :  { %v685_v8 = vpop.permute.xlu1 %684 }
 0x717   :  { %v687_v9 = vmul.f32 %v2553_v51, %v685_v8  ;;  %585 = vrot.lane.b32.xlu0 %v583_v7, %s2628_s16 }
 0x719   :  { %689 = vrot.lane.b32.xlu1 %v687_v9, %s2628_s16 }
 0x789   :  { %v586_v13 = vpop.permute.xlu0 %585 }
 0x78a   :  { %v2862_v14 = vadd.f32 %v586_v13, %v578_v11 }
 0x78b   :  { %v690_v16 = vpop.permute.xlu1 %689 }
 0x78c   :  { %2554 = vtanh.f32 %v2862_v14  ;;  %v2865_v17 = vadd.f32 %v690_v16, %v682_v15  ;;  %v154_v15 = vadd.f32 %v2716_v12, %v2798_v53 }
 0x78e   :  { %2556 = vtanh.f32 %v2865_v17 }
 0x796   :  { %v2555_v18 = vpop.eup %2554 }
 0x797   :  { %591 = vrot.lane.b32.xlu0 %v2555_v18, %s2627_s15 }
 0x798   :  { %v2557_v19 = vpop.eup %2556 }
 0x799   :  { %695 = vrot.lane.b32.xlu1 %v2557_v19, %s2627_s15 }
 0x809   :  { %v592_v20 = vpop.permute.xlu0 %591 }
 0x80a   :  { %v594_v21 = vmul.f32 %v2551_v62, %v592_v20 }
 0x80b   :  { %v696_v22 = vpop.permute.xlu1 %695 }
 0x80c   :  { %v698_v23 = vmul.f32 %v2553_v51, %v696_v22  ;;  %700 = vrot.lane.b32.xlu0 %v594_v21, %s2628_s16 }
 0x80e   :  { %802 = vrot.lane.b32.xlu1 %v698_v23, %s2627_s15 }
 0x87e   :  { %v701_v24 = vpop.permute.xlu0 %700 }
 0x87f   :  { %2202 = vmatmul.mubr.msk.f32.vlgmr.msra.gmra.mrb[6].mxu1 %vm186_vm2, %v701_v24 }
 0x880   :  { %2423 = vmatpush3.bf16.msra.mxu1 %v2743_v35  ;;  %2220 = vmatprep.mubr.msk.f32.mxu1 %vm2625_vm1, %v2626_v4  ;;  %v803_v25 = vpop.permute.xlu1 %802 }
 0x881   :  { %2424 = vmatprep.subr.bf16.mxu1 %v2624_v0  ;;  %v805_v26 = vsel %vm186_vm2, %v701_v24, %v803_v25 }
 0x884   :  { %2426 = vmatpush3.bf16.msra.mxu1 %v2754_v38 }
 0x885   :  { %2427 = vmatprep.subr.bf16.mxu1 %v2624_v0 }
 0x888   :  { %2429 = vmatpush3.bf16.msra.mxu1 %v2772_v43 }
 0x889   :  { %2430 = vmatprep.subr.bf16.mxu1 %v2624_v0 }
 0x88c   :  { %2432 = vmatpush3.bf16.msra.mxu1 %v2786_v47 }
 0x88d   :  { %2451 = vmatprep.subr.bf16.mxu1 %v2624_v0 }
 0x88f   :  { %2221 = vmatmul.mubr.msk.f32.vlgmr.msra.gmra.mrb[8].mxu1 %vm395_vm3, %v805_v26 }
 0x890   :  { %2453 = vmatpush3.bf16.msra.mxu1 %v2681_v5  ;;  %2261 = vmatprep.mubr.msk.f32.mxu1 %vm2625_vm1, %v2626_v4 }
 0x891   :  { %2454 = vmatprep.subr.bf16.mxu1 %v2624_v0 }
 0x894   :  { %2456 = vmatpush3.bf16.msra.mxu1 %v2698_v10 }
 0x895   :  { %2457 = vmatprep.subr.bf16.mxu1 %v2624_v0 }
 0x952   :  { %v770_v29 = vpop.f32.mrb[6].mxu1 }
 0x953   :  { %v774_v30 = vadd.f32 %v770_v29, %v149_v27  ;;  %v2203_v31 = vpop.f32.mrb[7].mxu1 }
 0x955   :  { %v1948_v32 = vmul.f32 -1.442695, %v774_v30 }
 0x957   :  { %2558 = vpow2.f32 %v1948_v32 }
 0x961   :  { %v2559_v33 = vpop.eup %2558 }
 0x962   :  { %v778_v34 = vadd.f32 1.0, %v2559_v33  ;;  %v875_v36 = vpop.f32.mrb[8].mxu1 }
 0x963   :  { %v876_v28 = vadd.f32 %v2828_v59, %v875_v36  ;;  %v2222_v37 = vpop.f32.mrb[9].mxu1 }
 0x964   :  { %2560 = vrcp.f32 %v778_v34 }
 0x965   :  { %v1951_v39 = vmul.f32 -1.442695, %v876_v28 }
 0x967   :  { %2562 = vpow2.f32 %v1951_v39 }
 0x96e   :  { %v2561_v40 = vpop.eup %2560 }
 0x96f   :  { %v781_v41 = vmul.f32 2.0, %v2561_v40  ;;  %v783_v60 = vmul.f32 %v2561_v40, %v2862_v14 }
 0x971   :  { %v2563_v42 = vpop.eup %2562  ;;  %v1949_v44 = vadd.f32 -1.0, %v781_v41 }
 0x972   :  { %v882_v45 = vadd.f32 1.0, %v2563_v42 }
 0x973   :  { %785 = vrot.lane.b32.xlu0 %v1949_v44, %s2627_s15 }
 0x974   :  { %2564 = vrcp.f32 %v882_v45 }
 0x97e   :  { %v2565_v50 = vpop.eup %2564 }
 0x97f   :  { %v885_v46 = vmul.f32 2.0, %v2565_v50  ;;  %v887_v51 = vmul.f32 %v2565_v50, %v2865_v17 }
 0x981   :  { %v1952_v48 = vadd.f32 -1.0, %v885_v46 }
 0x983   :  { %889 = vrot.lane.b32.xlu1 %v1952_v48, %s2627_s15 }
 0x9e5   :  { %v786_v49 = vpop.permute.xlu0 %785 }
 0x9e6   :  { %v788_v56 = vmul.f32 %v2561_v40, %v786_v49 }
 0x9e8   :  { %790 = vrot.lane.b32.xlu0 %v788_v56, %s2628_s16 }
 0x9f5   :  { %v890_v57 = vpop.permute.xlu1 %889 }
 0x9f6   :  { %v892_v58 = vmul.f32 %v2565_v50, %v890_v57 }
 0x9f8   :  { %894 = vrot.lane.b32.xlu1 %v892_v58, %s2628_s16 }
 0xa5a   :  { %v791_v61 = vpop.permute.xlu0 %790 }
 0xa5b   :  { %v2899_v62 = vadd.f32 %v791_v61, %v783_v60 }
 0xa5d   :  { %2566 = vtanh.f32 %v2899_v62 }
 0xa67   :  { %v2567_v63 = vpop.eup %2566 }
 0xa68   :  { %796 = vrot.lane.b32.xlu0 %v2567_v63, %s2627_s15 }
 0xa6a   :  { %v895_v1 = vpop.permute.xlu1 %894 }
 0xa6b   :  { %v2904_v2 = vadd.f32 %v895_v1, %v887_v51 }
 0xa6d   :  { %2568 = vtanh.f32 %v2904_v2 }
 0xa77   :  { %v2569_v3 = vpop.eup %2568 }
 0xa78   :  { %900 = vrot.lane.b32.xlu1 %v2569_v3, %s2627_s15 }
 0xada   :  { %v797_v6 = vpop.permute.xlu0 %796 }
 0xadb   :  { %v799_v7 = vmul.f32 %v2561_v40, %v797_v6 }
 0xadd   :  { %905 = vrot.lane.b32.xlu0 %v799_v7, %s2628_s16 }
 0xaea   :  { %v901_v8 = vpop.permute.xlu1 %900 }
 0xaeb   :  { %v903_v9 = vmul.f32 %v2565_v50, %v901_v8 }
 0xaed   :  { %1007 = vrot.lane.b32.xlu1 %v903_v9, %s2627_s15 }
 0xb4f   :  { %v906_v11 = vpop.permute.xlu0 %905 }
 0xb50   :  { %2232 = vmatmul.mubr.msk.f32.vlgmr.msra.gmra.mrb[12].mxu0 %vm186_vm2, %v906_v11 }
 0xb51   :  { %2441 = vmatpush3.bf16.msra.mxu0 %v2743_v35  ;;  %2250 = vmatprep.mubr.msk.f32.mxu0 %vm2625_vm1, %v2626_v4 }
 0xb52   :  { %2442 = vmatprep.subr.bf16.mxu0 %v2624_v0 }
 0xb55   :  { %2444 = vmatpush3.bf16.msra.mxu0 %v2754_v38 }
 0xb56   :  { %2445 = vmatprep.subr.bf16.mxu0 %v2624_v0 }
 0xb59   :  { %2447 = vmatpush3.bf16.msra.mxu0 %v2772_v43 }
 0xb5a   :  { %2448 = vmatprep.subr.bf16.mxu0 %v2624_v0 }
 0xb5d   :  { %2450 = vmatpush3.bf16.msra.mxu0 %v2786_v47 }
 0xb5e   :  { %2469 = vmatprep.subr.bf16.mxu0 %v2624_v0 }
 0xb5f   :  { %v1008_v13 = vpop.permute.xlu1 %1007 }
 0xb60   :  { %v1010_v14 = vsel %vm186_vm2, %v906_v11, %v1008_v13 }
 0xb61   :  { %2251 = vmatmul.mubr.msk.f32.vlgmr.msra.gmra.mrb[14].mxu0 %vm395_vm3, %v1010_v14 }
 0xb62   :  { %2471 = vmatpush3.bf16.msra.mxu0 %v2681_v5  ;;  %2291 = vmatprep.mubr.msk.f32.mxu0 %vm2625_vm1, %v2626_v4 }
 0xb63   :  { %2472 = vmatprep.subr.bf16.mxu0 %v2624_v0 }
 0xb66   :  { %2474 = vmatpush3.bf16.msra.mxu0 %v2698_v10 }
 0xb67   :  { %2475 = vmatprep.subr.bf16.mxu0 %v2624_v0 }
 0xc23   :  { %v975_v16 = vpop.f32.mrb[12].mxu0 }
 0xc24   :  { %v979_v17 = vadd.f32 %v975_v16, %v154_v15  ;;  %v2233_v18 = vpop.f32.mrb[13].mxu0 }
 0xc26   :  { %v1954_v19 = vmul.f32 -1.442695, %v979_v17 }
 0xc28   :  { %2570 = vpow2.f32 %v1954_v19 }
 0xc32   :  { %v2571_v20 = vpop.eup %2570 }
 0xc33   :  { %v983_v21 = vadd.f32 1.0, %v2571_v20 }
 0xc34   :  { %v1080_v22 = vpop.f32.mrb[14].mxu0 }
 0xc35   :  { %2572 = vrcp.f32 %v983_v21  ;;  %v1081_v23 = vadd.f32 %v2828_v59, %v1080_v22  ;;  %v2252_v24 = vpop.f32.mrb[15].mxu0 }
 0xc37   :  { %v1957_v25 = vmul.f32 -1.442695, %v1081_v23 }
 0xc39   :  { %2574 = vpow2.f32 %v1957_v25 }
 0xc3f   :  { %v2573_v26 = vpop.eup %2572 }
 0xc40   :  { %v986_v27 = vmul.f32 2.0, %v2573_v26  ;;  %v988_v39 = vmul.f32 %v2573_v26, %v2899_v62  ;;  %v159_v62 = vadd.f32 %v2796_v52, %v2716_v12 }
 0xc42   :  { %v1955_v29 = vadd.f32 -1.0, %v986_v27 }
 0xc43   :  { %v2575_v30 = vpop.eup %2574 }
 0xc44   :  { %v1087_v31 = vadd.f32 1.0, %v2575_v30  ;;  %990 = vrot.lane.b32.xlu0 %v1955_v29, %s2627_s15 }
 0xc46   :  { %2576 = vrcp.f32 %v1087_v31 }
 0xc50   :  { %v2577_v53 = vpop.eup %2576 }
 0xc51   :  { %v1090_v32 = vmul.f32 2.0, %v2577_v53  ;;  %v1092_v44 = vmul.f32 %v2577_v53, %v2904_v2 }
 0xc53   :  { %v1958_v33 = vadd.f32 -1.0, %v1090_v32 }
 0xc55   :  { %1094 = vrot.lane.b32.xlu1 %v1958_v33, %s2627_s15 }
 0xcb6   :  { %v991_v34 = vpop.permute.xlu0 %990 }
 0xcb7   :  { %v993_v36 = vmul.f32 %v2573_v26, %v991_v34 }
 0xcb9   :  { %995 = vrot.lane.b32.xlu0 %v993_v36, %s2628_s16 }
 0xcc7   :  { %v1095_v28 = vpop.permute.xlu1 %1094 }
 0xcc8   :  { %v1097_v37 = vmul.f32 %v2577_v53, %v1095_v28 }
 0xcca   :  { %1099 = vrot.lane.b32.xlu1 %v1097_v37, %s2628_s16  ;;  %v164_v37 = vadd.f32 %v2716_v12, %v2802_v55 }
 0xd2b   :  { %v996_v40 = vpop.permute.xlu0 %995 }
 0xd2c   :  { %v2937_v41 = vadd.f32 %v996_v40, %v988_v39 }
 0xd2e   :  { %2578 = vtanh.f32 %v2937_v41 }
 0xd38   :  { %v2579_v42 = vpop.eup %2578 }
 0xd39   :  { %1001 = vrot.lane.b32.xlu0 %v2579_v42, %s2627_s15 }
 0xd3c   :  { %v1100_v45 = vpop.permute.xlu1 %1099 }
 0xd3d   :  { %v2942_v50 = vadd.f32 %v1100_v45, %v1092_v44 }
 0xd3f   :  { %2580 = vtanh.f32 %v2942_v50 }
 0xd49   :  { %v2581_v46 = vpop.eup %2580 }
 0xd4a   :  { %1105 = vrot.lane.b32.xlu1 %v2581_v46, %s2627_s15 }
 0xdab   :  { %v1002_v48 = vpop.permute.xlu0 %1001 }
 0xdac   :  { %v1004_v49 = vmul.f32 %v2573_v26, %v1002_v48 }
 0xdae   :  { %1110 = vrot.lane.b32.xlu0 %v1004_v49, %s2628_s16 }
 0xdbc   :  { %v1106_v56 = vpop.permute.xlu1 %1105 }
 0xdbd   :  { %v1108_v57 = vmul.f32 %v2577_v53, %v1106_v56 }
 0xdbf   :  { %1212 = vrot.lane.b32.xlu1 %v1108_v57, %s2627_s15 }
 0xe20   :  { %v1111_v58 = vpop.permute.xlu0 %1110 }
 0xe21   :  { %2262 = vmatmul.mubr.msk.f32.vlgmr.msra.gmra.mrb[10].mxu1 %vm186_vm2, %v1111_v58 }
 0xe22   :  { %2459 = vmatpush3.bf16.msra.mxu1 %v2743_v35  ;;  %2280 = vmatprep.mubr.msk.f32.mxu1 %vm2625_vm1, %v2626_v4 }
 0xe23   :  { %2460 = vmatprep.subr.bf16.mxu1 %v2624_v0 }
 0xe26   :  { %2462 = vmatpush3.bf16.msra.mxu1 %v2754_v38 }
 0xe27   :  { %2463 = vmatprep.subr.bf16.mxu1 %v2624_v0 }
 0xe2a   :  { %2465 = vmatpush3.bf16.msra.mxu1 %v2772_v43 }
 0xe2b   :  { %2466 = vmatprep.subr.bf16.mxu1 %v2624_v0 }
 0xe2e   :  { %2468 = vmatpush3.bf16.msra.mxu1 %v2786_v47 }
 0xe2f   :  { %2487 = vmatprep.subr.bf16.mxu1 %v2624_v0 }
 0xe31   :  { %v1213_v60 = vpop.permute.xlu1 %1212 }
 0xe32   :  { %v1215_v61 = vsel %vm186_vm2, %v1111_v58, %v1213_v60 }
 0xe33   :  { %2281 = vmatmul.mubr.msk.f32.vlgmr.msra.gmra.mrb[12].mxu1 %vm395_vm3, %v1215_v61 }
 0xe34   :  { %2489 = vmatpush3.bf16.msra.mxu1 %v2681_v5  ;;  %2321 = vmatprep.mubr.msk.f32.mxu1 %vm2625_vm1, %v2626_v4 }
 0xe35   :  { %2490 = vmatprep.subr.bf16.mxu1 %v2624_v0 }
 0xe38   :  { %2492 = vmatpush3.bf16.msra.mxu1 %v2698_v10 }
 0xe39   :  { %2493 = vmatprep.subr.bf16.mxu1 %v2624_v0 }
 0xef4   :  { %v1180_v63 = vpop.f32.mrb[10].mxu1 }
 0xef5   :  { %v1184_v51 = vadd.f32 %v1180_v63, %v159_v62  ;;  %v2263_v1 = vpop.f32.mrb[11].mxu1 }
 0xef7   :  { %v1960_v2 = vmul.f32 -1.442695, %v1184_v51 }
 0xef9   :  { %2582 = vpow2.f32 %v1960_v2 }
 0xf03   :  { %v2583_v3 = vpop.eup %2582 }
 0xf04   :  { %v1188_v6 = vadd.f32 1.0, %v2583_v3 }
 0xf06   :  { %2584 = vrcp.f32 %v1188_v6  ;;  %v1285_v5 = vpop.f32.mrb[12].mxu1 }
 0xf07   :  { %v1286_v7 = vadd.f32 %v2828_v59, %v1285_v5  ;;  %v2282_v8 = vpop.f32.mrb[13].mxu1 }
 0xf09   :  { %v1963_v9 = vmul.f32 -1.442695, %v1286_v7 }
 0xf0b   :  { %2586 = vpow2.f32 %v1963_v9 }
 0xf10   :  { %v2585_v10 = vpop.eup %2584 }
 0xf11   :  { %v1191_v11 = vmul.f32 2.0, %v2585_v10  ;;  %v1193_v22 = vmul.f32 %v2585_v10, %v2937_v41 }
 0xf13   :  { %v1961_v13 = vadd.f32 -1.0, %v1191_v11 }
 0xf15   :  { %v2587_v14 = vpop.eup %2586  ;;  %1195 = vrot.lane.b32.xlu0 %v1961_v13, %s2627_s15 }
 0xf16   :  { %v1292_v52 = vadd.f32 1.0, %v2587_v14 }
 0xf18   :  { %2588 = vrcp.f32 %v1292_v52 }
 0xf22   :  { %v2589_v15 = vpop.eup %2588 }
 0xf23   :  { %v1295_v16 = vmul.f32 2.0, %v2589_v15  ;;  %v1297_v26 = vmul.f32 %v2589_v15, %v2942_v50 }
 0xf25   :  { %v1964_v17 = vadd.f32 -1.0, %v1295_v16 }
 0xf27   :  { %1299 = vrot.lane.b32.xlu1 %v1964_v17, %s2627_s15 }
 0xf87   :  { %v1196_v18 = vpop.permute.xlu0 %1195 }
 0xf88   :  { %v1198_v19 = vmul.f32 %v2585_v10, %v1196_v18 }
 0xf8a   :  { %1200 = vrot.lane.b32.xlu0 %v1198_v19, %s2628_s16 }
 0xf99   :  { %v1300_v20 = vpop.permute.xlu1 %1299 }
 0xf9a   :  { %v1302_v21 = vmul.f32 %v2589_v15, %v1300_v20 }
 0xf9c   :  { %1304 = vrot.lane.b32.xlu1 %v1302_v21, %s2628_s16 }
 0xffc   :  { %v1201_v23 = vpop.permute.xlu0 %1200 }
 0xffd   :  { %v2975_v24 = vadd.f32 %v1201_v23, %v1193_v22 }
 0xfff   :  { %2590 = vtanh.f32 %v2975_v24 }
0x1009   :  { %v2591_v25 = vpop.eup %2590 }
0x100a   :  { %1206 = vrot.lane.b32.xlu0 %v2591_v25, %s2627_s15 }
0x100e   :  { %v1305_v27 = vpop.permute.xlu1 %1304 }
0x100f   :  { %v2980_v29 = vadd.f32 %v1305_v27, %v1297_v26 }
0x1011   :  { %2592 = vtanh.f32 %v2980_v29 }
0x101b   :  { %v2593_v30 = vpop.eup %2592 }
0x101c   :  { %1310 = vrot.lane.b32.xlu1 %v2593_v30, %s2627_s15 }
0x107c   :  { %v1207_v31 = vpop.permute.xlu0 %1206 }
0x107d   :  { %v1209_v53 = vmul.f32 %v2585_v10, %v1207_v31 }
0x107f   :  { %1315 = vrot.lane.b32.xlu0 %v1209_v53, %s2628_s16 }
0x108e   :  { %v1311_v32 = vpop.permute.xlu1 %1310 }
0x108f   :  { %v1313_v33 = vmul.f32 %v2589_v15, %v1311_v32 }
0x1091   :  { %1417 = vrot.lane.b32.xlu1 %v1313_v33, %s2627_s15 }
0x10f1   :  { %v1316_v34 = vpop.permute.xlu0 %1315 }
0x10f2   :  { %2292 = vmatmul.mubr.msk.f32.vlgmr.msra.gmra.mrb[16].mxu0 %vm186_vm2, %v1316_v34 }
0x10f3   :  { %2477 = vmatpush3.bf16.msra.mxu0 %v2743_v35  ;;  %2310 = vmatprep.mubr.msk.f32.mxu0 %vm2625_vm1, %v2626_v4 }
0x10f4   :  { %2478 = vmatprep.subr.bf16.mxu0 %v2624_v0 }
0x10f7   :  { %2480 = vmatpush3.bf16.msra.mxu0 %v2754_v38 }
0x10f8   :  { %2481 = vmatprep.subr.bf16.mxu0 %v2624_v0 }
0x10fb   :  { %2483 = vmatpush3.bf16.msra.mxu0 %v2772_v43 }
0x10fc   :  { %2484 = vmatprep.subr.bf16.mxu0 %v2624_v0 }
0x10ff   :  { %2486 = vmatpush3.bf16.msra.mxu0 %v2786_v47 }
0x1100   :  { %2505 = vmatprep.subr.bf16.mxu0 %v2624_v0 }
0x1103   :  { %v1418_v36 = vpop.permute.xlu1 %1417 }
0x1104   :  { %v1420_v28 = vsel %vm186_vm2, %v1316_v34, %v1418_v36 }
0x1105   :  { %2311 = vmatmul.mubr.msk.f32.vlgmr.msra.gmra.mrb[18].mxu0 %vm395_vm3, %v1420_v28 }
0x1106   :  { %2507 = vmatpush3.bf16.msra.mxu0 %v2743_v35  ;;  %2359 = vmatprep.mubr.msk.f32.mxu0 %vm2625_vm1, %v2626_v4 }
0x1107   :  { %2508 = vmatprep.subr.bf16.mxu0 %v2624_v0 }
0x110a   :  { %2510 = vmatpush3.bf16.msra.mxu0 %v2754_v38 }
0x110b   :  { %2511 = vmatprep.subr.bf16.mxu0 %v2624_v0 }
0x110e   :  { %2513 = vmatpush3.bf16.msra.mxu0 %v2772_v43 }
0x110f   :  { %2514 = vmatprep.subr.bf16.mxu0 %v2624_v0 }
0x1112   :  { %2516 = vmatpush3.bf16.msra.mxu0 %v2786_v47 }
0x11c5   :  { %v1385_v39 = vpop.f32.mrb[16].mxu0 }
0x11c6   :  { %v1389_v40 = vadd.f32 %v1385_v39, %v164_v37  ;;  %v2293_v41 = vpop.f32.mrb[17].mxu0 }
0x11c8   :  { %v1966_v42 = vmul.f32 -1.442695, %v1389_v40 }
0x11ca   :  { %2594 = vpow2.f32 %v1966_v42 }
0x11d4   :  { %v2595_v44 = vpop.eup %2594 }
0x11d5   :  { %v1393_v45 = vadd.f32 1.0, %v2595_v44 }
0x11d7   :  { %2596 = vrcp.f32 %v1393_v45 }
0x11d8   :  { %v1490_v50 = vpop.f32.mrb[18].mxu0 }
0x11d9   :  { %v1491_v46 = vadd.f32 %v2828_v59, %v1490_v50  ;;  %v2312_v48 = vpop.f32.mrb[19].mxu0 }
0x11db   :  { %v1969_v49 = vmul.f32 -1.442695, %v1491_v46 }
0x11dd   :  { %2598 = vpow2.f32 %v1969_v49 }
0x11e1   :  { %v2597_v56 = vpop.eup %2596 }
0x11e2   :  { %v1396_v57 = vmul.f32 2.0, %v2597_v56  ;;  %v1398_v6 = vmul.f32 %v2597_v56, %v2975_v24 }
0x11e4   :  { %v1967_v58 = vadd.f32 -1.0, %v1396_v57 }
0x11e6   :  { %1400 = vrot.lane.b32.xlu0 %v1967_v58, %s2627_s15 }
0x11e7   :  { %v2599_v55 = vpop.eup %2598 }
0x11e8   :  { %v1497_v60 = vadd.f32 1.0, %v2599_v55 }
0x11ea   :  { %2600 = vrcp.f32 %v1497_v60 }
0x11f4   :  { %v2601_v61 = vpop.eup %2600 }
0x11f5   :  { %v1500_v62 = vmul.f32 2.0, %v2601_v61  ;;  %v1502_v9 = vmul.f32 %v2601_v61, %v2980_v29 }
0x11f7   :  { %v1970_v63 = vadd.f32 -1.0, %v1500_v62 }
0x11f9   :  { %1504 = vrot.lane.b32.xlu1 %v1970_v63, %s2627_s15 }
0x1258   :  { %v1401_v51 = vpop.permute.xlu0 %1400 }
0x1259   :  { %v1403_v1 = vmul.f32 %v2597_v56, %v1401_v51 }
0x125b   :  { %1405 = vrot.lane.b32.xlu0 %v1403_v1, %s2628_s16 }
0x126b   :  { %v1505_v2 = vpop.permute.xlu1 %1504 }
0x126c   :  { %v1507_v3 = vmul.f32 %v2601_v61, %v1505_v2 }
0x126e   :  { %1509 = vrot.lane.b32.xlu1 %v1507_v3, %s2628_s16 }
0x12cd   :  { %v1406_v5 = vpop.permute.xlu0 %1405 }
0x12ce   :  { %v1408_v7 = vadd.f32 %v1406_v5, %v1398_v6 }
0x12d0   :  { %2602 = vtanh.f32 %v1408_v7 }
0x12da   :  { %v2603_v8 = vpop.eup %2602 }
0x12db   :  { %1411 = vrot.lane.b32.xlu0 %v2603_v8, %s2627_s15 }
0x12e0   :  { %v1510_v10 = vpop.permute.xlu1 %1509 }
0x12e1   :  { %v1512_v11 = vadd.f32 %v1510_v10, %v1502_v9  ;;  %v1832_v10 = vld [vmem:[%s3079_s5 + $0x8] sm:$0xff] }
0x12e3   :  { %2604 = vtanh.f32 %v1512_v11 }
0x12ed   :  { %v2605_v13 = vpop.eup %2604 }
0x12ee   :  { %1515 = vrot.lane.b32.xlu1 %v2605_v13, %s2627_s15 }
0x134d   :  { %v1412_v14 = vpop.permute.xlu0 %1411 }
0x134e   :  { %v1414_v52 = vmul.f32 %v2597_v56, %v1412_v14  ;;  %v1834_v14 = vld [vmem:[%s3079_s5 + $0x18] sm:$0xff] }
0x1350   :  { %1520 = vrot.lane.b32.xlu0 %v1414_v52, %s2628_s16 }
0x1360   :  { %v1516_v15 = vpop.permute.xlu1 %1515 }
0x1361   :  { %v1518_v16 = vmul.f32 %v2601_v61, %v1516_v15 }
0x1363   :  { %1622 = vrot.lane.b32.xlu1 %v1518_v16, %s2627_s15 }
0x13c2   :  { %v1521_v17 = vpop.permute.xlu0 %1520 }
0x13c3   :  { %2322 = vmatmul.mubr.msk.f32.vlgmr.msra.gmra.mrb[14].mxu1 %vm186_vm2, %v1521_v17 }
0x13c4   :  { %2495 = vmatpush3.bf16.msra.mxu1 %v2743_v35  ;;  %2340 = vmatprep.mubr.msk.f32.mxu1 %vm2625_vm1, %v2626_v4 }
0x13c5   :  { %2496 = vmatprep.subr.bf16.mxu1 %v2624_v0 }
0x13c8   :  { %2498 = vmatpush3.bf16.msra.mxu1 %v2754_v38  ;;  %v169_v38 = vadd.f32 %v2800_v54, %v2716_v12 }
0x13c9   :  { %2499 = vmatprep.subr.bf16.mxu1 %v2624_v0 }
0x13cc   :  { %2501 = vmatpush3.bf16.msra.mxu1 %v2772_v43 }
0x13cd   :  { %2502 = vmatprep.subr.bf16.mxu1 %v2624_v0 }
0x13d0   :  { %2504 = vmatpush3.bf16.msra.mxu1 %v2786_v47 }
0x13d1   :  { %2517 = vmatprep.subr.bf16.mxu1 %v2624_v0 }
0x13d5   :  { %v1623_v18 = vpop.permute.xlu1 %1622 }
0x13d6   :  { %v1625_v35 = vsel %vm186_vm2, %v1521_v17, %v1623_v18 }
0x13d7   :  { %2341 = vmatmul.mubr.msk.f32.vlgmr.msra.gmra.mrb[16].mxu1 %vm395_vm3, %v1625_v35  ;;  %v1980_v35 = vld [vmem:[%s3080_s6] ss:$0 sm:$0xff] }
0x13d8   :  { %2370 = vmatprep.mubr.msk.f32.mxu1 %vm2625_vm1, %v2626_v4 }
0x1496   :  { %v1590_v19 = vpop.f32.mrb[14].mxu1 }
0x1497   :  { %v1594_v20 = vadd.f32 %v1590_v19, %v169_v38  ;;  %v2323_v43 = vpop.f32.mrb[15].mxu1 }
0x1499   :  { %v1972_v21 = vmul.f32 -1.442695, %v1594_v20 }
0x149b   :  { %2606 = vpow2.f32 %v1972_v21 }
0x14a5   :  { %v2607_v22 = vpop.eup %2606 }
0x14a6   :  { %v1598_v47 = vadd.f32 1.0, %v2607_v22 }
0x14a8   :  { %2608 = vrcp.f32 %v1598_v47 }
0x14aa   :  { %v1695_v23 = vpop.f32.mrb[16].mxu1 }
0x14ab   :  { %v1696_v24 = vadd.f32 %v2828_v59, %v1695_v23  ;;  %v2342_v25 = vpop.f32.mrb[17].mxu1 }
0x14ad   :  { %v1975_v26 = vmul.f32 -1.442695, %v1696_v24 }
0x14af   :  { %2610 = vpow2.f32 %v1975_v26 }
0x14b2   :  { %v2609_v27 = vpop.eup %2608 }
0x14b3   :  { %v1601_v29 = vmul.f32 2.0, %v2609_v27  ;;  %v1603_v28 = vmul.f32 %v2609_v27, %v1408_v7 }
0x14b5   :  { %v1973_v4 = vadd.f32 -1.0, %v1601_v29 }
0x14b7   :  { %1605 = vrot.lane.b32.xlu0 %v1973_v4, %s2627_s15 }
0x14b9   :  { %v2611_v12 = vpop.eup %2610 }
0x14ba   :  { %v1702_v54 = vadd.f32 1.0, %v2611_v12 }
0x14bc   :  { %2612 = vrcp.f32 %v1702_v54 }
0x14c6   :  { %v2613_v30 = vpop.eup %2612 }
0x14c7   :  { %v1705_v31 = vmul.f32 2.0, %v2613_v30  ;;  %v1707_v41 = vmul.f32 %v2613_v30, %v1512_v11  ;;  %v1833_v11 = vld [vmem:[%s3079_s5 + $0x10] sm:$0xff] }
0x14c8   :  { %v2521_v52 = vpack.c.bf16 %v1834_v14, %v1833_v11 }
0x14c9   :  { %v1976_v53 = vadd.f32 -1.0, %v1705_v31 }
0x14cb   :  { %1709 = vrot.lane.b32.xlu1 %v1976_v53, %s2627_s15 }
0x1529   :  { %v1606_v32 = vpop.permute.xlu0 %1605 }
0x152a   :  { %v1608_v33 = vmul.f32 %v2609_v27, %v1606_v32 }
0x152c   :  { %1610 = vrot.lane.b32.xlu0 %v1608_v33, %s2628_s16 }
0x153d   :  { %v1710_v34 = vpop.permute.xlu1 %1709 }
0x153e   :  { %v1712_v36 = vmul.f32 %v2613_v30, %v1710_v34 }
0x1540   :  { %1714 = vrot.lane.b32.xlu1 %v1712_v36, %s2628_s16 }
0x159e   :  { %v1611_v37 = vpop.permute.xlu0 %1610 }
0x159f   :  { %v1613_v39 = vadd.f32 %v1611_v37, %v1603_v28 }
0x15a1   :  { %2614 = vtanh.f32 %v1613_v39 }
0x15ab   :  { %v2615_v40 = vpop.eup %2614 }
0x15ac   :  { %1616 = vrot.lane.b32.xlu0 %v2615_v40, %s2627_s15 }
0x15b2   :  { %v1715_v42 = vpop.permute.xlu1 %1714 }
0x15b3   :  { %v1717_v44 = vadd.f32 %v1715_v42, %v1707_v41 }
0x15b5   :  { %2616 = vtanh.f32 %v1717_v44 }
0x15bf   :  { %v2617_v45 = vpop.eup %2616 }
0x15c0   :  { %1720 = vrot.lane.b32.xlu1 %v2617_v45, %s2627_s15 }
0x161e   :  { %v1617_v50 = vpop.permute.xlu0 %1616 }
0x161f   :  { %v1619_v46 = vmul.f32 %v2609_v27, %v1617_v50 }
0x1621   :  { %1725 = vrot.lane.b32.xlu0 %v1619_v46, %s2628_s16 }
0x1632   :  { %v1721_v48 = vpop.permute.xlu1 %1720 }
0x1633   :  { %v1723_v49 = vmul.f32 %v2613_v30, %v1721_v48 }
0x1635   :  { %1729 = vrot.lane.b32.xlu1 %v1723_v49, %s2627_s15 }
0x1693   :  { %v1726_v56 = vpop.permute.xlu0 %1725 }
0x16a7   :  { %v1730_v57 = vpop.permute.xlu1 %1729 }
0x16a8   :  { %v1732_v58 = vsel %vm186_vm2, %v1726_v56, %v1730_v57 }
0x16a9   :  { %2360 = vmatmul.mubr.msk.f32.vlgmr.msra.gmra.mrb[20].mxu0 %vm395_vm3, %v1732_v58 }
0x177c   :  { %v1802_v55 = vpop.f32.mrb[20].mxu0 }
0x177d   :  { %v1803_v60 = vadd.f32 %v2828_v59, %v1802_v55  ;;  %v2361_v61 = vpop.f32.mrb[21].mxu0  ;;  %v1831_v59 = vld [vmem:[%s3079_s5] sm:$0xff] }
0x177e   :  { %v2518_v13 = vpack.c.bf16 %v1832_v10, %v1831_v59 }
0x177f   :  { %v1978_v62 = vmul.f32 -1.442695, %v1803_v60 }
0x1780   :  { %2519 = vmatpush3.bf16.msra.mxu1 %v2518_v13 }
0x1781   :  { %2618 = vpow2.f32 %v1978_v62  ;;  %2520 = vmatprep.subr.bf16.mxu1 %v2624_v0 }
0x1784   :  { %2522 = vmatpush3.bf16.msra.mxu1 %v2521_v52 }
0x178b   :  { %v2619_v63 = vpop.eup %2618 }
0x178c   :  { %v1809_v51 = vadd.f32 1.0, %v2619_v63 }
0x178e   :  { %2620 = vrcp.f32 %v1809_v51 }
0x1798   :  { %v2621_v1 = vpop.eup %2620 }
0x1799   :  { %v1812_v2 = vmul.f32 2.0, %v2621_v1  ;;  %v1814_v7 = vmul.f32 %v2621_v1, %v1717_v44 }
0x179b   :  { %v1979_v3 = vadd.f32 -1.0, %v1812_v2 }
0x179d   :  { %1816 = vrot.lane.b32.xlu0 %v1979_v3, %s2627_s15 }
0x180f   :  { %v1817_v6 = vpop.permute.xlu0 %1816 }
0x1810   :  { %v1819_v5 = vmul.f32 %v2621_v1, %v1817_v6 }
0x1812   :  { %1821 = vrot.lane.b32.xlu1 %v1819_v5, %s2628_s16 }
0x1884   :  { %v1822_v8 = vpop.permute.xlu1 %1821 }
0x1885   :  { %v1824_v9 = vadd.f32 %v1822_v8, %v1814_v7 }
0x1887   :  { %2622 = vtanh.f32 %v1824_v9 }
0x1891   :  { %v2623_v15 = vpop.eup %2622 }
0x1892   :  { %1827 = vrot.lane.b32.xlu0 %v2623_v15, %s2627_s15 }
0x1904   :  { %v1828_v16 = vpop.permute.xlu0 %1827 }
0x1905   :  { %v1830_v17 = vmul.f32 %v2621_v1, %v1828_v16 }
0x1907   :  { %1843 = vrot.lane.b32.xlu1 %v1830_v17, %s2628_s16 }
0x1979   :  { %v1844_v18 = vpop.permute.xlu1 %1843 }
0x197a   :  { %2371 = vmatmul.mubr.msk.f32.vlgmr.msra.gmra.mrb[18].mxu1 %vm186_vm2, %v1844_v18 }
0x1a4d   :  { %v1913_v38 = vpop.f32.mrb[18].mxu1 }
0x1a4e   :  { %v1914_v19 = vadd.f32 %v1980_v35, %v1913_v38  ;;  %v2372_v20 = vpop.f32.mrb[19].mxu1 }
0x1a50   :  { %1917 = vst [vmem:[%s3081_s7] sm:$0xff] %v1914_v19 }

</bundles_post_ra>
